<compile_context>
chip_gen: v6e
topology: v6e:2x2x1
jax: 0.10.0
libtpu: 0.0.40
codegen_flags: <defaults>
</compile_context>

<pallas_src>
import jax
import jax.numpy as jnp
from jax import lax
from jax.experimental import pallas as pl
from jax.experimental.pallas import tpu as pltpu


# Batch rows packed side-by-side into one lane-dense row.  PACK=8 makes the
# output block exactly 8*16 = 128 lanes for the module's Fo=16 (unmasked
# stores) and the activation blocks 8*32 = 256 lanes (no lane padding).
PACK = 8
_MAX_TILE_ROWS = 32768  # per-step DMA >= ~5x the ~0.35us step overhead on v7x


def _round_up(x, m):
    return (x + m - 1) // m * m


def _vmem_capacity_bytes():
    try:
        return int(pltpu.get_tpu_info().vmem_capacity_bytes)
    except Exception:
        return 128 << 20  # conservative default (v5e/v6e physical VMEM)


def _block_diag(mat, pack, dtype):
    """(F, Fo) -> (F*pack, Fo*pack) with `pack` copies of `mat` on the diagonal."""
    return jnp.kron(jnp.eye(pack, dtype=dtype), mat.astype(dtype))


def _ensembler_kernel(xu_ref, xi_ref, wu_ref, wi_ref, b_ref, o_ref):
    # Lane-packed fused "concat + dense" on one batch tile.
    #   xu_ref/xi_ref : (tile_p, Fu*PACK) / (tile_p, Fi*PACK) packed activations
    #   wu_ref/wi_ref : (Fu*PACK, Fo*PACK) / (Fi*PACK, Fo*PACK) block-diag W^T (f32)
    #   b_ref         : (1, Fo*PACK) bias tiled PACK times (f32)
    # Activations may be bf16 (halved HBM reads); weight stays f32-resident and
    # the MXU accumulates in f32.  The VPU cast hides behind the tile DMA.
    xu = xu_ref[...].astype(jnp.float32)
    xi = xi_ref[...].astype(jnp.float32)
    acc = lax.dot_general(
        xu, wu_ref[...],
        dimension_numbers=(((1,), (0,)), ((), ())),
        preferred_element_type=jnp.float32,
        precision=lax.Precision.HIGHEST,
    )
    acc = acc + lax.dot_general(
        xi, wi_ref[...],
        dimension_numbers=(((1,), (0,)), ((), ())),
        preferred_element_type=jnp.float32,
        precision=lax.Precision.HIGHEST,
    )
    o_ref[...] = (acc + b_ref[...]).astype(o_ref.dtype)


def ensembler_forward(x_user, x_item, weight, bias, *, tile_rows=None,
                      min_pallas_rows=2048):
    """
    x_user: (N, Fu), x_item: (N, Fi)   (f32 or bf16 activations)
    weight: (Fo, Fu + Fi) float32      (PyTorch nn.Linear convention)
    bias:   (Fo,) float32
    returns (N, Fo) in x_user's dtype.
    """
    N, Fu = x_user.shape
    N2, Fi = x_item.shape
    Fo, Fin = weight.shape
    assert N == N2 and Fin == Fu + Fi
    out_dtype = x_user.dtype
    assert x_item.dtype == x_user.dtype

    # Small-N fallback: at tiny batches (the deployed N=8 case) pallas_call
    # launch + DMA setup dwarfs the work; plain XLA fusion is strictly faster.
    if N < min_pallas_rows:
        hidden = jnp.concatenate([x_user, x_item], axis=1).astype(jnp.float32)
        out = jnp.einsum("nf,of->no", hidden, weight.astype(jnp.float32),
                         precision=lax.Precision.HIGHEST) + bias.astype(jnp.float32)
        return out.astype(out_dtype)

    act_b = jnp.dtype(x_user.dtype).itemsize
    out_b = jnp.dtype(out_dtype).itemsize

    # --- lane-dense repack (free, row-major reshapes) -------------------------
    n_pad = _round_up(N, PACK)
    if n_pad != N:
        # TODO(synk): row padding copies the inputs once; producers should hand
        # over PACK-aligned batches so this stays a pure metadata reshape.
        x_user = jnp.pad(x_user, ((0, n_pad - N), (0, 0)))
        x_item = jnp.pad(x_item, ((0, n_pad - N), (0, 0)))
    np_rows = n_pad // PACK
    xu_p = x_user.reshape(np_rows, Fu * PACK)
    xi_p = x_item.reshape(np_rows, Fi * PACK)

    lu, li, lo = Fu * PACK, Fi * PACK, Fo * PACK
    # Block-diagonal W^T: packed_x @ wX_blk applies W^T independently to each
    # of the PACK batch rows living side by side in the lanes.  Kept in f32
    # (tiny, VMEM-resident) for full accuracy at zero bandwidth cost.
    wu_blk = _block_diag(weight[:, :Fu].T, PACK, jnp.float32)   # (lu, lo)
    wi_blk = _block_diag(weight[:, Fu:].T, PACK, jnp.float32)   # (li, lo)
    b_p = jnp.tile(bias.astype(jnp.float32), PACK).reshape(1, lo)

    # --- generation-aware tile sizing & VMEM budget ---------------------------
    vmem_cap = _vmem_capacity_bytes()
    tile_budget = int(vmem_cap * 0.70)          # ~90 MiB v5e/v6e, ~45 MiB v7x
    per_prow = 2 * ((_round_up(lu, 128) + _round_up(li, 128)) * act_b
                    + _round_up(lo, 128) * out_b)               # double-buffered
    fixed = (2 * (lu + li) * _round_up(lo, 128) * 4             # weights
             + 2 * 8 * _round_up(lo, 128) * 4)                  # bias
    cap_rows = _MAX_TILE_ROWS if tile_rows is None else int(tile_rows)
    tile_p = min(max(1, (tile_budget - fixed - (4 << 20)) // per_prow),
                 max(1, cap_rows // PACK))
    align = 8 * max(1, 4 // act_b)              # 8 (f32) / 16 (bf16) sublanes
    if tile_p >= np_rows:
        tile_p = np_rows                        # block == full dim: always legal
    else:
        tile_p = max(align, (tile_p // align) * align)
        tile_p = min(tile_p, np_rows)

    vmem_est = fixed + per_prow * tile_p
    vmem_limit = max(16 << 20,
                     min(int(vmem_est * 1.25) + (4 << 20), int(vmem_cap * 0.8)))

    grid = (pl.cdiv(np_rows, tile_p),)

    out_p = pl.pallas_call(
        _ensembler_kernel,
        out_shape=jax.ShapeDtypeStruct((np_rows, lo), out_dtype),
        grid=grid,
        in_specs=[
            pl.BlockSpec((tile_p, lu), lambda i: (i, 0)),   # packed x_user tile
            pl.BlockSpec((tile_p, li), lambda i: (i, 0)),   # packed x_item tile
            pl.BlockSpec((lu, lo), lambda i: (0, 0)),       # block-diag Wu^T, resident
            pl.BlockSpec((li, lo), lambda i: (0, 0)),       # block-diag Wi^T, resident
            pl.BlockSpec((1, lo), lambda i: (0, 0)),        # tiled bias, resident
        ],
        out_specs=pl.BlockSpec((tile_p, lo), lambda i: (i, 0)),
        compiler_params=pltpu.CompilerParams(
            # TODO(synk): on v7x use pltpu.CORE_PARALLEL / pl.core_map so both
            # TensorCores (each with its own HBM path) split the batch grid.
            dimension_semantics=("parallel",),
            vmem_limit_bytes=vmem_limit,
        ),
    )(xu_p, xi_p, wu_blk, wi_blk, b_p)

    # Free reshape back to row-per-sample layout; drop padded rows.
    return out_p.reshape(n_pad, Fo)[:N]


def ensembler_reference(x_user, x_item, weight, bias):
    hidden = jnp.concatenate([x_user, x_item], axis=1).astype(jnp.float32)
    return jnp.einsum("nf,of->no", hidden, weight.astype(jnp.float32),
                      precision=lax.Precision.HIGHEST) + bias.astype(jnp.float32)


if __name__ == "__main__":
    # Module hyperparameters (num_hidden_edge_feature is unused by forward).
    num_hidden_feature_user = 32
    num_hidden_feature_item = 32
    num_out_feature = 16

    key = jax.random.PRNGKey(0)
    k_xu, k_xi, k_w, k_b, k_xu2, k_xi2 = jax.random.split(key, 6)

    in_feat = num_hidden_feature_user + num_hidden_feature_item
    bound = 1.0 / (in_feat ** 0.5)  # PyTorch default Linear init bound
    weight = jax.random.uniform(k_w, (num_out_feature, in_feat), jnp.float32,
                                minval=-bound, maxval=bound)
    bias = jax.random.uniform(k_b, (num_out_feature,), jnp.float32,
                              minval=-bound, maxval=bound)

    # 1) Deployed-size batch (N=8): small-N fallback path (plain XLA fusion).
    batch = 8
    x_user = jax.random.normal(k_xu, (batch, num_hidden_feature_user), jnp.float32)
    x_item = jax.random.normal(k_xi, (batch, num_hidden_feature_item), jnp.float32)
    ref = ensembler_reference(x_user, x_item, weight, bias)
    out = jax.block_until_ready(ensembler_forward(x_user, x_item, weight, bias))
    assert out.shape == (batch, num_out_feature)
    assert jnp.allclose(out, ref, atol=1e-4, rtol=1e-4)

    # 1b) Same tiny batch, Pallas forced (exercises the packed single-step grid).
    out_p = jax.block_until_ready(
        ensembler_forward(x_user, x_item, weight, bias, min_pallas_rows=0))
    assert jnp.allclose(out_p, ref, atol=1e-4, rtol=1e-4)

    # 2) Multi-step grid with row padding (N not a multiple of PACK) and a
    #    ragged last tile (small tile_rows to force several grid steps).
    batch2 = 1003
    xu2 = jax.random.normal(k_xu2, (batch2, num_hidden_feature_user), jnp.float32)
    xi2 = jax.random.normal(k_xi2, (batch2, num_hidden_feature_item), jnp.float32)
    ref2 = ensembler_reference(xu2, xi2, weight, bias)
    out2 = jax.block_until_ready(
        ensembler_forward(xu2, xi2, weight, bias, min_pallas_rows=0, tile_rows=256))
    assert out2.shape == (batch2, num_out_feature)
    assert jnp.allclose(out2, ref2, atol=1e-4, rtol=1e-4)

    # 3) bf16 activations from the producer (halved HBM read traffic); weight
    #    stays f32-resident, f32 accumulation.  No wrapper-side cast round trip.
    out3 = jax.block_until_ready(
        ensembler_forward(xu2.astype(jnp.bfloat16), xi2.astype(jnp.bfloat16),
                          weight, bias, min_pallas_rows=0))
    assert out3.shape == (batch2, num_out_feature)
    assert jnp.allclose(out3.astype(jnp.float32), ref2, atol=5e-2, rtol=5e-2)

    print("KERNEL_OK")
</pallas_src>

<mosaic_0001>
module attributes {stable_mosaic.version = 11 : i64} {
  func.func @_ensembler_kernel(%arg0: i32, %arg1: memref<1x256xf32, #tpu.memory_space<vmem>>, %arg2: memref<1x256xf32, #tpu.memory_space<vmem>>, %arg3: memref<256x128xf32, #tpu.memory_space<vmem>>, %arg4: memref<256x128xf32, #tpu.memory_space<vmem>>, %arg5: memref<1x128xf32, #tpu.memory_space<vmem>>, %arg6: memref<1x128xf32, #tpu.memory_space<vmem>>) attributes {dimension_semantics = [#tpu.dimension_semantics<parallel>], iteration_bounds = array<i64: 1>, scalar_prefetch = 0 : i64, scratch_operands = 0 : i64, tpu.core_type = #tpu.core_type<tc>, window_params = [{transform_indices = @transform_0, window_bounds = array<i64: 1, 256>}, {transform_indices = @transform_1, window_bounds = array<i64: 1, 256>}, {pipeline_mode = #tpu.pipeline_mode<synchronous>, transform_indices = @transform_2, window_bounds = array<i64: 256, 128>}, {pipeline_mode = #tpu.pipeline_mode<synchronous>, transform_indices = @transform_3, window_bounds = array<i64: 256, 128>}, {pipeline_mode = #tpu.pipeline_mode<synchronous>, transform_indices = @transform_4, window_bounds = array<i64: 1, 128>}, {transform_indices = @transform_5, window_bounds = array<i64: 1, 128>}]} {
    %c0 = arith.constant 0 : index
    %c0_0 = arith.constant 0 : index
    %0 = vector.load %arg1[%c0, %c0_0] : memref<1x256xf32, #tpu.memory_space<vmem>>, vector<1x256xf32>
    %c0_1 = arith.constant 0 : index
    %c0_2 = arith.constant 0 : index
    %1 = vector.load %arg2[%c0_1, %c0_2] : memref<1x256xf32, #tpu.memory_space<vmem>>, vector<1x256xf32>
    %c0_3 = arith.constant 0 : index
    %c0_4 = arith.constant 0 : index
    %2 = vector.load %arg3[%c0_3, %c0_4] : memref<256x128xf32, #tpu.memory_space<vmem>>, vector<256x128xf32>
    %cst = arith.constant dense<0.000000e+00> : vector<1x128xf32>
    %3 = tpu.matmul %0, %2, %cst {dimension_numbers = #tpu.dot_dimension_numbers<[1], [0], [0], [1], [0, 0, 1, 1], [], []>, precision = #tpu.contract_precision<fp32>} : vector<1x256xf32>, vector<256x128xf32>, vector<1x128xf32> -> vector<1x128xf32>
    %c0_5 = arith.constant 0 : index
    %c0_6 = arith.constant 0 : index
    %4 = vector.load %arg4[%c0_5, %c0_6] : memref<256x128xf32, #tpu.memory_space<vmem>>, vector<256x128xf32>
    %cst_7 = arith.constant dense<0.000000e+00> : vector<1x128xf32>
    %5 = tpu.matmul %1, %4, %cst_7 {dimension_numbers = #tpu.dot_dimension_numbers<[1], [0], [0], [1], [0, 0, 1, 1], [], []>, precision = #tpu.contract_precision<fp32>} : vector<1x256xf32>, vector<256x128xf32>, vector<1x128xf32> -> vector<1x128xf32>
    %6 = arith.addf %3, %5 : vector<1x128xf32>
    %c0_8 = arith.constant 0 : index
    %c0_9 = arith.constant 0 : index
    %7 = vector.load %arg5[%c0_8, %c0_9] : memref<1x128xf32, #tpu.memory_space<vmem>>, vector<1x128xf32>
    %8 = arith.addf %6, %7 : vector<1x128xf32>
    %c0_10 = arith.constant 0 : index
    %c0_11 = arith.constant 0 : index
    %9 = vector.load %arg6[%c0_10, %c0_11] : memref<1x128xf32, #tpu.memory_space<vmem>>, vector<1x128xf32>
    tpu.vector_store %arg6[%c0_10, %c0_11], %8 {strides = array<i32>} : memref<1x128xf32, #tpu.memory_space<vmem>>, vector<1x128xf32>,
    return
  }
  func.func @transform_0(%arg0: i32) -> (i32, i32) {
    %c0_i32 = arith.constant 0 : i32
    %c0_i32_0 = arith.constant 0 : i32
    return %arg0, %c0_i32 : i32, i32
  }
  func.func @transform_1(%arg0: i32) -> (i32, i32) {
    %c0_i32 = arith.constant 0 : i32
    %c0_i32_0 = arith.constant 0 : i32
    return %arg0, %c0_i32 : i32, i32
  }
  func.func @transform_2(%arg0: i32) -> (i32, i32) {
    %c0_i32 = arith.constant 0 : i32
    %c0_i32_0 = arith.constant 0 : i32
    %c0_i32_1 = arith.constant 0 : i32
    return %c0_i32, %c0_i32_0 : i32, i32
  }
  func.func @transform_3(%arg0: i32) -> (i32, i32) {
    %c0_i32 = arith.constant 0 : i32
    %c0_i32_0 = arith.constant 0 : i32
    %c0_i32_1 = arith.constant 0 : i32
    return %c0_i32, %c0_i32_0 : i32, i32
  }
  func.func @transform_4(%arg0: i32) -> (i32, i32) {
    %c0_i32 = arith.constant 0 : i32
    %c0_i32_0 = arith.constant 0 : i32
    %c0_i32_1 = arith.constant 0 : i32
    return %c0_i32, %c0_i32_0 : i32, i32
  }
  func.func @transform_5(%arg0: i32) -> (i32, i32) {
    %c0_i32 = arith.constant 0 : i32
    %c0_i32_0 = arith.constant 0 : i32
    return %arg0, %c0_i32 : i32, i32
  }
}

</mosaic_0001>

<bundles_post_ra>
// kernel: tpu_custom_call.1
= control target key start
LH: loop header
LB: loop body
LE: loop exit
PB: predicated region body
PF: predicated region fallthrough
CT: control target
= control target key end

     0   :  { %10 = vsyncpa [#allocation3], 0  ;;  %s3699_s0 = inlined_call_operand.hbm [shape: f32[1,256], index: 0, kind: input, shape index: {}]   ;;  %s3700_s1 = inlined_call_operand.hbm [shape: f32[1,256], index: 1, kind: input, shape index: {}]   ;;  %s3701_s2 = inlined_call_operand.hbm [shape: f32[256,128], index: 2, kind: input, shape index: {}]   ;;  %s3702_s3 = inlined_call_operand.hbm [shape: f32[256,128], index: 3, kind: input, shape index: {}]   ;;  %s3703_s4 = inlined_call_operand.vmem [shape: f32[1,128], index: 4, kind: input, shape index: {}]   ;;  %s3704_s5 = inlined_call_operand.hbm [shape: f32[1,128], index: 5, kind: output, shape index: {}]  }
   0x1   :  { %11 = vsyncpa [#allocation6], 0 }
   0x2   :  { %12 = vsyncpa [#allocation9], 0 }
   0x3   :  { %13 = vsyncpa [#allocation4], 0  ;;  %s2439_s18 = smov [#allocation5]   ;;  %s2440_s20 = smov [#allocation2]  }
   0x4   :  { %s30_s19 = sshll.u32 %s2439_s18, 4  ;;  %s20_s21 = sshll.u32 %s2440_s20, 4  ;;  %s31_s19 = int_to_ptr.vmem [resolvable:$true] %s30_s19  ;;  %s21_s21 = int_to_ptr.vmem [resolvable:$true] %s20_s21 }
   0x5   :  { %s2339_s22 = scalar_lea.vmem %s31_s19, 32  ;;  %p2344_p1 = scmp.lt.s32.totalorder %s31_s19, %s31_s19 }
   0x6   :  { %p2340_p0 = scmp.ne.s32.totalorder %s31_s19, %s2339_s22  ;;  %p2345_p2 = scmp.lt.s32.totalorder %s2339_s22, %s2339_s22 }
   0x8   :  { %p2346_p3 = por %p2345_p2, %p2344_p1 }
   0xa   :  { %p2347_p4 = pnand %p2346_p3, %p2340_p0 }
   0xc   :  { %2350 = shalt.err (!%p2347_p4)
}
   0xd   :  { %33 = dma.hbm_to_vmem [thread:$0]  %s3700_s1, 32, %s31_s19, [#allocation6]  }
   0xe   :  { %s2359_s25 = scalar_lea.vmem %s21_s21, 32  ;;  %p2364_p6 = scmp.lt.s32.totalorder %s21_s21, %s21_s21 }
   0xf   :  { %p2360_p5 = scmp.ne.s32.totalorder %s21_s21, %s2359_s25  ;;  %p2365_p7 = scmp.lt.s32.totalorder %s2359_s25, %s2359_s25 }
  0x11   :  { %p2366_p8 = por %p2365_p7, %p2364_p6 }
  0x13   :  { %p2367_p9 = pnand %p2366_p8, %p2360_p5 }
  0x15   :  { %2370 = shalt.err (!%p2367_p9)
}
  0x16   :  { %23 = dma.hbm_to_vmem [thread:$0]  %s3699_s0, 32, %s21_s21, [#allocation3]  }
  0x17   :  { %s2441_s28 = smov [#allocation7]  }
  0x18   :  { %s39_s29 = sshll.u32 %s2441_s28, 4  ;;  %s40_s29 = int_to_ptr.vmem [resolvable:$true] %s39_s29 }
  0x19   :  { %s2379_s30 = scalar_lea.vmem %s40_s29, 4096  ;;  %p2384_p11 = scmp.lt.s32.totalorder %s40_s29, %s40_s29 }
  0x1a   :  { %p2380_p10 = scmp.ne.s32.totalorder %s40_s29, %s2379_s30  ;;  %p2385_p12 = scmp.lt.s32.totalorder %s2379_s30, %s2379_s30 }
  0x1c   :  { %p2386_p13 = por %p2385_p12, %p2384_p11 }
  0x1e   :  { %p2387_p0 = pnand %p2386_p13, %p2380_p10 }
  0x20   :  { %2390 = shalt.err (!%p2387_p0)
}
  0x21   :  { %s2442_s1 = smov 128   ;;  %s2443_s6 = smov 8  }
  0x22   :  { %45 = dma.hbm_to_vmem [thread:$0]  %s3701_s2, 4096, %s40_s29, [#allocation6], %s2442_s1, %s2442_s1, %s2443_s6  }
  0x23   :  { %s2444_s9 = smov [#allocation8]  }
  0x24   :  { %s51_s10 = sshll.u32 %s2444_s9, 4  ;;  %s52_s10 = int_to_ptr.vmem [resolvable:$true] %s51_s10 }
  0x25   :  { %s2399_s0 = scalar_lea.vmem %s52_s10, 4096  ;;  %p2404_p2 = scmp.lt.s32.totalorder %s52_s10, %s52_s10 }
  0x26   :  { %p2400_p1 = scmp.ne.s32.totalorder %s52_s10, %s2399_s0  ;;  %p2405_p3 = scmp.lt.s32.totalorder %s2399_s0, %s2399_s0 }
  0x28   :  { %p2406_p4 = por %p2405_p3, %p2404_p2 }
  0x2a   :  { %p2407_p5 = pnand %p2406_p4, %p2400_p1 }
  0x2c   :  { %2410 = shalt.err (!%p2407_p5)
}
  0x2d   :  { %57 = dma.hbm_to_vmem [thread:$0]  %s3702_s3, 4096, %s52_s10, [#allocation9], %s2442_s1, %s2442_s1, %s2443_s6  }
  0x2e   :  { %2431 = dma.done.wait [#allocation3], 32  }
  0x2f   :  { %2432 = vsyncadd [#allocation3], 4294967264 }
  0x30   :  { %2433 = dma.done.wait [#allocation6], 4128  }
  0x31   :  { %2434 = vsyncadd [#allocation6], 4294963168 }
  0x32   :  { %2435 = dma.done.wait [#allocation9], 4096  }
  0x33   :  { %2436 = vsyncadd [#allocation9], 4294963200  ;;  %v139_v0 = vlaneseq  ;;  %v137_v2 = vld [vmem:[#allocation8 + $0xf8] sm:$0xff]  ;;  %v136_v4 = vld [vmem:[#allocation8 + $0xf0] sm:$0xff]  ;;  %s2445_s13 = smov [#allocation10]  }
  0x34   :  { %v121_v3 = vld [vmem:[#allocation8 + $0x78] sm:$0xff]  ;;  %v2492_v7 = vand.u32 4294901760, %v137_v2  ;;  %v2496_v9 = vand.u32 4294901760, %v136_v4  ;;  %v120_v10 = vld [vmem:[#allocation8 + $0x70] sm:$0xff]  ;;  %v135_v11 = vld [vmem:[#allocation8 + $0xe8] sm:$0xff]  ;;  %s1893_s14 = sshll.u32 %s2445_s13, 4  ;;  %s1894_s14 = int_to_ptr.vmem [resolvable:$true] %s1893_s14 }
  0x35   :  { %v2488_v1 = vshrl.u32 %v139_v0, 7  ;;  %v2494_v8 = vand.u32 4294901760, %v121_v3  ;;  %v119_v12 = vld [vmem:[#allocation8 + $0x68] sm:$0xff]  ;;  %v2498_v13 = vand.u32 4294901760, %v120_v10  ;;  %v2500_v14 = vand.u32 4294901760, %v135_v11  ;;  %v134_v16 = vld [vmem:[#allocation8 + $0xe0] sm:$0xff]  ;;  %p2416_p7 = scmp.lt.s32.totalorder %s1894_s14, %s1894_s14 }
  0x36   :  { %v2502_v15 = vand.u32 4294901760, %v119_v12  ;;  %v118_v17 = vld [vmem:[#allocation8 + $0x60] sm:$0xff]  ;;  %v133_v18 = vld [vmem:[#allocation8 + $0xd8] sm:$0xff]  ;;  %1904 = vmatprep.subr.mxu0 %v2492_v7  ;;  %v2505_v19 = vand.u32 4294901760, %v134_v16  ;;  %v2512_v22 = vsub.f32 %v137_v2, %v2492_v7  ;;  %v2516_v24 = vld [vmem:[#allocation8 + $0xd0] sm:$0xff]  ;;  %v2531_v29 = vsub.f32 %v136_v4, %v2496_v9  ;;  %s2411_s15 = scalar_lea.vmem %s1894_s14, 16 }
  0x37   :  { %3841 = vst [vmem:[#allocation15_spill] sm:$0xff] %v2488_v1  ;;  %v2507_v20 = vand.u32 4294901760, %v118_v17  ;;  %v2509_v21 = vand.u32 4294901760, %v133_v18  ;;  %v2514_v23 = vld [vmem:[#allocation8 + $0x58] sm:$0xff]  ;;  %v2518_v25 = vld [vmem:[#allocation8 + $0x50] sm:$0xff]  ;;  %1905 = vmatpush3.msra.mxu0 %v2494_v8  ;;  %v2525_v27 = vsub.f32 %v121_v3, %v2494_v8  ;;  %v2528_v28 = vand.u32 4294901760, %v2516_v24  ;;  %p2412_p6 = scmp.ne.s32.totalorder %s1894_s14, %s2411_s15 }
  0x38   :  { %v2522_v26 = vand.u32 4294901760, %v2514_v23  ;;  %v2533_v30 = vld [vmem:[#allocation8 + $0xc8] sm:$0xff]  ;;  %v2537_v32 = vld [vmem:[#allocation8 + $0xc0] sm:$0xff]  ;;  %1906 = vmatprep.subr.mxu0 %v2496_v9  ;;  %v3716_v33 = vand.u32 4294901760, %v2512_v22  ;;  %v2542_v34 = vand.u32 4294901760, %v2518_v25  ;;  %v2545_v35 = vsub.f32 %v120_v10, %v2498_v13  ;;  %v2583_v50 = vld [vmem:[#allocation8 + $0xb8] sm:$0xff] }
  0x39   :  { %v2535_v31 = vld [vmem:[#allocation8 + $0x48] sm:$0xff]  ;;  %v2548_v36 = vand.u32 4294901760, %v2533_v30  ;;  %1907 = vmatpush3.msra.mxu0 %v2498_v13  ;;  %v3714_v37 = vand.u32 4294901760, %v2525_v27  ;;  %v3713_v38 = vand.u32 4294901760, %v2531_v29  ;;  %v2554_v39 = vsub.f32 %v135_v11, %v2500_v14  ;;  %v2559_v41 = vld [vmem:[#allocation8 + $0x40] sm:$0xff]  ;;  %v2593_v55 = vld [vmem:[#allocation8 + $0x38] sm:$0xff] }
  0x3a   :  { %3842 = vst [vmem:[#allocation16_spill] sm:$0xff] %v2542_v34  ;;  %v2557_v40 = vand.u32 4294901760, %v2535_v31  ;;  %1908 = vmatprep.subr.mxu0 %v2500_v14  ;;  %v377_v42 = vsub.f32 %v2512_v22, %v3716_v33  ;;  %v3711_v43 = vand.u32 4294901760, %v2545_v35  ;;  %v2567_v44 = vsub.f32 %v119_v12, %v2502_v15  ;;  %v2600_v60 = vld [vmem:[#allocation8 + $0xb0] sm:$0xff]  ;;  %v2624_v12 = vld [vmem:[#allocation8 + $0xa8] sm:$0xff]  ;;  %s2415_s16 = scalar_lea.vmem %s1894_s14, 32 }
  0x3b   :  { %3843 = vst [vmem:[#allocation17_spill] sm:$0xff] %v2548_v36  ;;  %v2570_v45 = vand.u32 4294901760, %v2537_v32  ;;  %1909 = vmatpush3.msra.mxu0 %v2502_v15  ;;  %v265_v46 = vsub.f32 %v2525_v27, %v3714_v37  ;;  %v384_v47 = vsub.f32 %v2531_v29, %v3713_v38  ;;  %v3709_v48 = vand.u32 4294901760, %v2554_v39  ;;  %v2612_v2 = vld [vmem:[#allocation8 + $0x30] sm:$0xff]  ;;  %v2702_v38 = vld [vmem:[#allocation8 + $0x18] sm:$0xff]  ;;  %p2417_p8 = scmp.lt.s32.totalorder %s2415_s16, %s2411_s15 }
  0x3c   :  { %3844 = vst [vmem:[#allocation18_spill] sm:$0xff] %v2557_v40  ;;  %v2581_v49 = vsub.f32 %v134_v16, %v2505_v19  ;;  %1910 = vmatprep.subr.mxu0 %v2505_v19  ;;  %v378_v51 = vand.u32 4294901760, %v377_v42  ;;  %v272_v52 = vsub.f32 %v2545_v35, %v3711_v43  ;;  %v3708_v53 = vand.u32 4294901760, %v2567_v44  ;;  %v2715_v33 = vld [vmem:[#allocation8 + $0x90] sm:$0xff] }
  0x3d   :  { %3845 = vst [vmem:[#allocation19_spill] sm:$0xff] %v2570_v45  ;;  %v2591_v54 = vand.u32 4294901760, %v2559_v41  ;;  %1911 = vmatpush3.msra.mxu0 %v2507_v20  ;;  %v266_v56 = vand.u32 4294901760, %v265_v46  ;;  %v385_v57 = vand.u32 4294901760, %v384_v47  ;;  %v391_v58 = vsub.f32 %v2554_v39, %v3709_v48  ;;  %v2725_v6 = vld [vmem:[#allocation8 + $0x10] sm:$0xff]  ;;  %p2418_p9 = por %p2417_p8, %p2416_p7 }
  0x3e   :  { %v3706_v59 = vand.u32 4294901760, %v2581_v49  ;;  %1912 = vmatprep.subr.mxu0 %v2509_v21  ;;  %1939 = vmatprep.subr.mxu1 %v378_v51  ;;  %v273_v61 = vand.u32 4294901760, %v272_v52  ;;  %v279_v62 = vsub.f32 %v2567_v44, %v3708_v53  ;;  %v2607_v63 = vsub.f32 %v118_v17, %v2507_v20  ;;  %v2681_v53 = vld [vmem:[#allocation8 + $0x20] sm:$0xff] }
  0x3f   :  { %3846 = vst [vmem:[#allocation20_spill] sm:$0xff] %v2591_v54  ;;  %v2610_v0 = vand.u32 4294901760, %v2583_v50  ;;  %1913 = vmatpush3.msra.mxu0 %v2522_v26  ;;  %1940 = vmatpush3.msra.mxu1 %v266_v56  ;;  %v392_v3 = vand.u32 4294901760, %v391_v58  ;;  %v2619_v10 = vsub.f32 %v133_v18, %v2509_v21  ;;  %v2622_v11 = vand.u32 4294901760, %v2593_v55  ;;  %v2635_v18 = vld [vmem:[#allocation8 + $0x28] sm:$0xff]  ;;  %p2419_p10 = pnand %p2418_p9, %p2412_p6 }
  0x40   :  { %v398_v4 = vsub.f32 %v2581_v49, %v3706_v59  ;;  %1914 = vmatprep.subr.mxu0 %v2528_v28  ;;  %1941 = vmatprep.subr.mxu1 %v385_v57  ;;  %v280_v16 = vand.u32 4294901760, %v279_v62  ;;  %v3705_v17 = vand.u32 4294901760, %v2607_v63  ;;  %v2630_v42 = vsub.f32 %v2514_v23, %v2522_v26 }
  0x41   :  { %3847 = vst [vmem:[#allocation21_spill] sm:$0xff] %v2610_v0  ;;  %3848 = vst [vmem:[#allocation22_spill] sm:$0xff] %v2622_v11  ;;  %v2633_v46 = vand.u32 4294901760, %v2600_v60  ;;  %1915 = vmatpush3.msra.mxu0 %v2542_v34  ;;  %1942 = vmatpush3.msra.mxu1 %v273_v61  ;;  %v3707_v51 = vand.u32 4294901760, %v2619_v10  ;;  %v2641_v52 = vsub.f32 %v2516_v24, %v2528_v28  ;;  %v2644_v56 = vand.u32 4294901760, %v2612_v2  ;;  %v2658_v24 = vld [vmem:[#allocation8 + $0xa0] sm:$0xff] }
  0x42   :  { %v399_v47 = vand.u32 4294901760, %v398_v4  ;;  %1916 = vmatprep.subr.mxu0 %v2548_v36  ;;  %1943 = vmatprep.subr.mxu1 %v392_v3  ;;  %v286_v23 = vsub.f32 %v2607_v63, %v3705_v17  ;;  %v3710_v57 = vand.u32 4294901760, %v2630_v42  ;;  %v2653_v58 = vsub.f32 %v2518_v25, %v2542_v34 }
  0x43   :  { %3849 = vst [vmem:[#allocation23_spill] sm:$0xff] %v2633_v46  ;;  %3850 = vst [vmem:[#allocation24_spill] sm:$0xff] %v2644_v56  ;;  %v2656_v61 = vand.u32 4294901760, %v2624_v12  ;;  %1917 = vmatpush3.msra.mxu0 %v2557_v40  ;;  %1944 = vmatpush3.msra.mxu1 %v280_v16  ;;  %v405_v62 = vsub.f32 %v2619_v10, %v3707_v51  ;;  %v3712_v3 = vand.u32 4294901760, %v2641_v52  ;;  %v2670_v25 = vand.u32 4294901760, %v2635_v18 }
  0x44   :  { %v2667_v4 = vsub.f32 %v2533_v30, %v2548_v36  ;;  %1918 = vmatprep.subr.mxu0 %v2570_v45  ;;  %1945 = vmatprep.subr.mxu1 %v399_v47  ;;  %v287_v17 = vand.u32 4294901760, %v286_v23  ;;  %v293_v16 = vsub.f32 %v2630_v42, %v3710_v57  ;;  %v3715_v59 = vand.u32 4294901760, %v2653_v58  ;;  %v2691_v57 = vld [vmem:[#allocation8 + $0x98] sm:$0xff] }
  0x45   :  { %3851 = vst [vmem:[#allocation25_spill] sm:$0xff] %v2656_v61  ;;  %3852 = vst [vmem:[#allocation26_spill] sm:$0xff] %v2670_v25  ;;  %v2679_v51 = vsub.f32 %v2535_v31, %v2557_v40  ;;  %1919 = vmatpush3.msra.mxu0 %v2591_v54  ;;  %v406_v30 = vand.u32 4294901760, %v405_v62  ;;  %v412_v47 = vsub.f32 %v2641_v52, %v3712_v3  ;;  %v2689_v48 = vand.u32 4294901760, %v2658_v24  ;;  %v73_v36 = vld [vmem:[#allocation5] sm:$0x3] }
  0x46   :  { %v3717_v23 = vand.u32 4294901760, %v2667_v4  ;;  %1946 = vmatpush3.msra.mxu1 %v287_v17  ;;  %1920 = vmatprep.subr.mxu0 %v2610_v0  ;;  %v294_v31 = vand.u32 4294901760, %v293_v16  ;;  %v300_v43 = vsub.f32 %v2653_v58, %v3715_v59  ;;  %v2700_v3 = vsub.f32 %v2537_v32, %v2570_v45 }
  0x47   :  { %3853 = vst [vmem:[#allocation27_spill] sm:$0xff] %v2689_v48  ;;  %v3718_v62 = vand.u32 4294901760, %v2679_v51  ;;  %1947 = vmatprep.subr.mxu1 %v406_v30  ;;  %1921 = vmatpush3.msra.mxu0 %v2622_v11  ;;  %v413_v37 = vand.u32 4294901760, %v412_v47  ;;  %v2709_v16 = vand.u32 4294901760, %v2681_v53  ;;  %v2713_v59 = vsub.f32 %v2559_v41, %v2591_v54 }
  0x48   :  { %v419_v17 = vsub.f32 %v2667_v4, %v3717_v23  ;;  %1948 = vmatpush3.msra.mxu1 %v294_v31  ;;  %1922 = vmatprep.subr.mxu0 %v2633_v46  ;;  %v301_v32 = vand.u32 4294901760, %v300_v43  ;;  %v2723_v23 = vand.u32 4294901760, %v2691_v57  ;;  %v2731_v43 = vsub.f32 %v2583_v50, %v2610_v0 }
  0x49   :  { %3854 = vst [vmem:[#allocation28_spill] sm:$0xff] %v2709_v16  ;;  %v307_v30 = vsub.f32 %v2679_v51, %v3718_v62  ;;  %1949 = vmatprep.subr.mxu1 %v413_v37  ;;  %1923 = vmatpush3.msra.mxu0 %v2644_v56  ;;  %v3725_v31 = vand.u32 4294901760, %v2713_v59  ;;  %v2734_v5 = vand.u32 4294901760, %v2702_v38  ;;  %v2736_v62 = vld [vmem:[#allocation8 + $0x88] sm:$0xff]  ;;  %v3857_v37 = vand.u32 4294901760, %v2700_v3 }
  0x4a   :  { %3855 = vst [vmem:[#allocation29_spill] sm:$0xff] %v2723_v23  ;;  %v420_v41 = vand.u32 4294901760, %v419_v17  ;;  %1950 = vmatpush3.msra.mxu1 %v301_v32  ;;  %1924 = vmatprep.subr.mxu0 %v2656_v61  ;;  %v2744_v17 = vsub.f32 %v2593_v55, %v2622_v11  ;;  %v2747_v50 = vand.u32 4294901760, %v2715_v33  ;;  %v2756_v0 = vsub.f32 %v2600_v60, %v2633_v46  ;;  %v2761_v55 = vld [vmem:[#allocation8 + $0x8] sm:$0xff]  ;;  %v2772_v60 = vld [vmem:[#allocation8 + $0x80] sm:$0xff] }
  0x4b   :  { %3856 = vst [vmem:[#allocation30_spill] sm:$0xff] %v2734_v5  ;;  %v308_v47 = vand.u32 4294901760, %v307_v30  ;;  %v426_v54 = vsub.f32 %v2700_v3, %v3857_v37  ;;  %1925 = vmatpush3.msra.mxu0 %v2670_v25  ;;  %v314_v32 = vsub.f32 %v2713_v59, %v3725_v31  ;;  %v2759_v37 = vand.u32 4294901760, %v2725_v6 }
  0x4c   :  { %1951 = vmatprep.subr.mxu1 %v420_v41  ;;  %3858 = vst [vmem:[#allocation31_spill] sm:$0xff] %v2756_v0  ;;  %1926 = vmatprep.subr.mxu0 %v2689_v48  ;;  %v2767_v31 = vsub.f32 %v2612_v2, %v2644_v56  ;;  %v2770_v30 = vand.u32 4294901760, %v2736_v62  ;;  %v3861_v45 = vand.u32 4294901760, %v2731_v43  ;;  %v2781_v11 = vsub.f32 %v2624_v12, %v2656_v61 }
  0x4d   :  { %3859 = vst [vmem:[#allocation32_spill] sm:$0xff] %v2759_v37  ;;  %1952 = vmatpush3.msra.mxu1 %v308_v47  ;;  %v427_v41 = vand.u32 4294901760, %v426_v54  ;;  %1927 = vmatpush3.msra.mxu0 %v2709_v16  ;;  %v315_v46 = vand.u32 4294901760, %v314_v32  ;;  %v3863_v2 = vand.u32 4294901760, %v2744_v17  ;;  %v2789_v32 = vand.u32 4294901760, %v2761_v55  ;;  %v2795_v54 = vld [vmem:[#allocation8] sm:$0xff] }
  0x4e   :  { %3860 = vst [vmem:[#allocation33_spill] sm:$0xff] %v2770_v30  ;;  %v433_v47 = vsub.f32 %v2731_v43, %v3861_v45  ;;  %3862 = vst [vmem:[#allocation34_spill] sm:$0xff] %v2781_v11  ;;  %1928 = vmatprep.subr.mxu0 %v2723_v23  ;;  %v2793_v45 = vsub.f32 %v2635_v18, %v2670_v25  ;;  %v2803_v40 = vand.u32 4294901760, %v2772_v60  ;;  %v3866_v18 = vand.u32 4294901760, %v2767_v31 }
  0x4f   :  { %1953 = vmatprep.subr.mxu1 %v427_v41  ;;  %v321_v56 = vsub.f32 %v2744_v17, %v3863_v2  ;;  %3864 = vst [vmem:[#allocation35_spill] sm:$0xff] %v2789_v32  ;;  %1929 = vmatpush3.msra.mxu0 %v2734_v5  ;;  %v3865_v41 = vand.u32 4294901760, %v2756_v0  ;;  %v3746_v2 = vand.u32 4294901760, %v2781_v11  ;;  %v2812_v25 = vsub.f32 %v2658_v24, %v2689_v48 }
  0x50   :  { %1954 = vmatpush3.msra.mxu1 %v315_v46  ;;  %v434_v12 = vand.u32 4294901760, %v433_v47  ;;  %1930 = vmatprep.subr.mxu0 %v2747_v50  ;;  %v328_v46 = vsub.f32 %v2767_v31, %v3866_v18  ;;  %v2823_v18 = vsub.f32 %v2681_v53, %v2709_v16  ;;  %v3867_v24 = vand.u32 4294901760, %v2793_v45 }
  0x51   :  { %v440_v61 = vsub.f32 %v2756_v0, %v3865_v41  ;;  %v322_v34 = vand.u32 4294901760, %v321_v56  ;;  %1931 = vmatpush3.msra.mxu0 %v2759_v37  ;;  %v447_v56 = vsub.f32 %v2781_v11, %v3746_v2  ;;  %v2819_v0 = vand.u32 4294901760, %v2795_v54 }
  0x52   :  { %1955 = vmatprep.subr.mxu1 %v434_v12  ;;  %v329_v47 = vand.u32 4294901760, %v328_v46  ;;  %1932 = vmatprep.subr.mxu0 %v2770_v30  ;;  %v3752_v12 = vand.u32 4294901760, %v2812_v25  ;;  %v3868_v48 = vsub.s32 0, %v2488_v1  ;;  %v3751_v53 = vand.u32 4294901760, %v2823_v18 }
  0x53   :  { %v441_v41 = vand.u32 4294901760, %v440_v61  ;;  %1956 = vmatpush3.msra.mxu1 %v322_v34  ;;  %v335_v61 = vsub.f32 %v2793_v45, %v3867_v24  ;;  %v448_v11 = vand.u32 4294901760, %v447_v56  ;;  %1933 = vmatpush3.msra.mxu0 %v2789_v32  ;;  %v3869_v34 = vsub.s32 1, %v2488_v1 }
  0x54   :  { %v142_v2 = vrot.slane %v73_v36, %v3868_v48  ;;  %v2838_v16 = vsub.f32 %v2691_v57, %v2723_v23  ;;  %1934 = vmatprep.subr.mxu0 %v2803_v40  ;;  %v454_v48 = vsub.f32 %v2812_v25, %v3752_v12  ;;  %v2848_v56 = vsub.f32 %v2702_v38, %v2734_v5 }
  0x55   :  { %1957 = vmatprep.subr.mxu1 %v441_v41  ;;  %v146_v46 = vrot.slane %v73_v36, %v3869_v34  ;;  %v336_v24 = vand.u32 4294901760, %v335_v61  ;;  %1935 = vmatpush3.msra.mxu0 %v2819_v0  ;;  %v342_v36 = vsub.f32 %v2823_v18, %v3751_v53  ;;  %v2859_v61 = vsub.f32 %v2715_v33, %v2747_v50 }
  0x56   :  { %1958 = vmatpush3.msra.mxu1 %v329_v47  ;;  %v2844_v41 = vand.u32 4294901760, %v142_v2  ;;  %v455_v34 = vand.u32 4294901760, %v454_v48  ;;  %1974 = vmatprep.subr.mxu0 %v2512_v22  ;;  %v2868_v53 = vsub.f32 %v2725_v6, %v2759_v37  ;;  %v3872_v33 = vand.u32 4294901760, %v2838_v16 }
  0x57   :  { %1959 = vmatprep.subr.mxu1 %v448_v11  ;;  %v2854_v57 = vand.u32 4294901760, %v146_v46  ;;  %v3755_v11 = vand.u32 4294901760, %v2848_v56  ;;  %v343_v12 = vand.u32 4294901760, %v342_v36  ;;  %v3760_v48 = vand.u32 4294901760, %v2859_v61 }
  0x58   :  { %3870 = vst [vmem:[#allocation36_spill] sm:$0xff] %v2844_v41  ;;  %1960 = vmatpush3.msra.mxu1 %v336_v24  ;;  %v2863_v38 = vsub.f32 %v142_v2, %v2844_v41  ;;  %v461_v24 = vsub.f32 %v2838_v16, %v3872_v33  ;;  %v2893_v2 = vsub.f32 %v2761_v55, %v2789_v32 }
  0x59   :  { %3871 = vst [vmem:[#allocation37_spill] sm:$0xff] %v2854_v57  ;;  %v2871_v47 = vsub.f32 %v146_v46, %v2854_v57  ;;  %486 = vmatprep.mubr.f32.mxu1 %v2854_v57  ;;  %1961 = vmatprep.subr.mxu1 %v455_v34  ;;  %v349_v6 = vsub.f32 %v2848_v56, %v3755_v11 }
  0x5a   :  { %v2885_v46 = vsub.f32 %v2736_v62, %v2770_v30  ;;  %1962 = vmatpush3.msra.mxu1 %v343_v12  ;;  %v462_v1 = vand.u32 4294901760, %v461_v24  ;;  %v468_v34 = vsub.f32 %v2859_v61, %v3760_v48  ;;  %v3873_v11 = vand.u32 4294901760, %v2863_v38 }
  0x5b   :  { %v350_v57 = vand.u32 4294901760, %v349_v6  ;;  %v3874_v62 = vand.u32 4294901760, %v2868_v53  ;;  %v3875_v24 = vand.u32 4294901760, %v2871_v47  ;;  %v3767_v55 = vand.u32 4294901760, %v2893_v2 }
  0x5c   :  { %v254_v36 = vsub.f32 %v2863_v38, %v3873_v11  ;;  %v3768_v33 = vand.u32 4294901760, %v2885_v46  ;;  %1963 = vmatprep.subr.mxu1 %v462_v1  ;;  %v469_v48 = vand.u32 4294901760, %v468_v34  ;;  %v2908_v32 = vsub.f32 %v2772_v60, %v2803_v40 }
  0x5d   :  { %v356_v12 = vsub.f32 %v2868_v53, %v3874_v62  ;;  %v248_v30 = vsub.f32 %v2871_v47, %v3875_v24  ;;  %1964 = vmatpush3.msra.mxu1 %v350_v57  ;;  %v2915_v37 = vsub.f32 %v2795_v54, %v2819_v0  ;;  %v363_v1 = vsub.f32 %v2893_v2, %v3767_v55  ;;  %v3890_v55 = vld [vmem:[#allocation27_spill] sm:$0xff] }
  0x5e   :  { %v255_v11 = vand.u32 4294901760, %v254_v36  ;;  %v475_v62 = vsub.f32 %v2885_v46, %v3768_v33  ;;  %1965 = vmatprep.subr.mxu1 %v469_v48  ;;  %v3766_v60 = vand.u32 4294901760, %v2908_v32  ;;  %v3891_v33 = vld [vmem:[#allocation28_spill] sm:$0xff] }
  0x5f   :  { %v357_v6 = vand.u32 4294901760, %v356_v12  ;;  %3876 = vst [vmem:[#allocation38_spill] sm:$0xff] %v2915_v37  ;;  %v249_v24 = vand.u32 4294901760, %v248_v30  ;;  %v3765_v57 = vand.u32 4294901760, %v2915_v37  ;;  %v364_v34 = vand.u32 4294901760, %v363_v1  ;;  %v3881_v1 = vld [vmem:[#allocation34_spill] sm:$0xff] }
  0x60   :  { %v476_v36 = vand.u32 4294901760, %v475_v62  ;;  %v482_v12 = vsub.f32 %v2908_v32, %v3766_v60  ;;  %v3879_v62 = vld [vmem:[#allocation17_spill] sm:$0xff]  ;;  %v3889_v60 = vld [vmem:[#allocation26_spill] sm:$0xff] }
  0x61   :  { %1966 = vmatpush3.msra.mxu1 %v357_v6  ;;  %250 = vmatprep.mubr.f32.mxu0 %v249_v24  ;;  %v370_v30 = vsub.f32 %v2915_v37, %v3765_v57  ;;  %v3878_v6 = vld [vmem:[#allocation31_spill] sm:$0xff]  ;;  %v3880_v24 = vld [vmem:[#allocation18_spill] sm:$0xff]  ;;  %v3888_v57 = vld [vmem:[#allocation25_spill] sm:$0xff] }
  0x62   :  { %256 = vmatmul.mubr.f32.vlgmr.msra.gmra.mxu0 %v255_v11  ;;  %1967 = vmatprep.subr.mxu1 %v476_v36  ;;  %v483_v54 = vand.u32 4294901760, %v482_v12  ;;  %v3877_v11 = vld [vmem:[#allocation16_spill] sm:$0xff]  ;;  %v3882_v36 = vld [vmem:[#allocation19_spill] sm:$0xff]  ;;  %v3884_v12 = vld [vmem:[#allocation21_spill] sm:$0xff] }
  0x63   :  { %1975 = vmatpush3.msra.mxu0 %v2525_v27  ;;  %1968 = vmatpush3.msra.mxu1 %v364_v34  ;;  %v371_v48 = vand.u32 4294901760, %v370_v30  ;;  %v3883_v34 = vld [vmem:[#allocation20_spill] sm:$0xff]  ;;  %v3885_v30 = vld [vmem:[#allocation22_spill] sm:$0xff] }
  0x64   :  { %1976 = vmatprep.subr.mxu0 %v2531_v29  ;;  %623 = vmatprep.mubr.f32.mxu0 %v2871_v47 }
  0x65   :  { %1977 = vmatpush3.msra.mxu0 %v2545_v35  ;;  %1969 = vmatprep.subr.mxu1 %v483_v54  ;;  %v3886_v54 = vld [vmem:[#allocation23_spill] sm:$0xff] }
  0x66   :  { %1978 = vmatprep.subr.mxu0 %v2554_v39  ;;  %1970 = vmatpush3.msra.mxu1 %v371_v48  ;;  %v3887_v48 = vld [vmem:[#allocation24_spill] sm:$0xff] }
  0x67   :  { %1979 = vmatpush3.msra.mxu0 %v2567_v44  ;;  %488 = vmatmul.mubr.f32.vlgmr.msra.gmra.mxu1 %v2844_v41  ;;  %v3892_v41 = vand.u32 4294901760, %v2512_v22  ;;  %v3899_v22 = vld [vmem:[#allocation35_spill] sm:$0xff] }
  0x68   :  { %1980 = vmatprep.subr.mxu0 %v2581_v49  ;;  %2009 = vmatprep.subr.mxu1 %v2492_v7 }
  0x69   :  { %1981 = vmatpush3.msra.mxu0 %v2607_v63  ;;  %2010 = vmatpush3.msra.mxu1 %v2494_v8 }
  0x6a   :  { %1982 = vmatprep.subr.mxu0 %v2619_v10  ;;  %2011 = vmatprep.subr.mxu1 %v2496_v9 }
  0x6b   :  { %1983 = vmatpush3.msra.mxu0 %v2630_v42  ;;  %2012 = vmatpush3.msra.mxu1 %v2498_v13 }
  0x6c   :  { %1984 = vmatprep.subr.mxu0 %v2641_v52  ;;  %2013 = vmatprep.subr.mxu1 %v2500_v14 }
  0x6d   :  { %1985 = vmatpush3.msra.mxu0 %v2653_v58  ;;  %2014 = vmatpush3.msra.mxu1 %v2502_v15 }
  0x6e   :  { %1986 = vmatprep.subr.mxu0 %v2667_v4  ;;  %2015 = vmatprep.subr.mxu1 %v2505_v19 }
  0x6f   :  { %1987 = vmatpush3.msra.mxu0 %v2679_v51  ;;  %2016 = vmatpush3.msra.mxu1 %v2507_v20 }
  0x70   :  { %1988 = vmatprep.subr.mxu0 %v2700_v3  ;;  %2017 = vmatprep.subr.mxu1 %v2509_v21 }
  0x71   :  { %1989 = vmatpush3.msra.mxu0 %v2713_v59  ;;  %2018 = vmatpush3.msra.mxu1 %v2522_v26 }
  0x72   :  { %1990 = vmatprep.subr.mxu0 %v2731_v43  ;;  %2019 = vmatprep.subr.mxu1 %v2528_v28 }
  0x73   :  { %1991 = vmatpush3.msra.mxu0 %v2744_v17  ;;  %2020 = vmatpush3.msra.mxu1 %v3877_v11 }
  0x74   :  { %1992 = vmatprep.subr.mxu0 %v3878_v6  ;;  %2021 = vmatprep.subr.mxu1 %v3879_v62 }
  0x75   :  { %1993 = vmatpush3.msra.mxu0 %v2767_v31  ;;  %2022 = vmatpush3.msra.mxu1 %v3880_v24 }
  0x76   :  { %1994 = vmatprep.subr.mxu0 %v3881_v1  ;;  %2023 = vmatprep.subr.mxu1 %v3882_v36 }
  0x77   :  { %1995 = vmatpush3.msra.mxu0 %v2793_v45  ;;  %2024 = vmatpush3.msra.mxu1 %v3883_v34 }
  0x78   :  { %1996 = vmatprep.subr.mxu0 %v2812_v25  ;;  %2025 = vmatprep.subr.mxu1 %v3884_v12 }
  0x79   :  { %1997 = vmatpush3.msra.mxu0 %v2823_v18  ;;  %2026 = vmatpush3.msra.mxu1 %v3885_v30 }
  0x7a   :  { %1998 = vmatprep.subr.mxu0 %v2838_v16  ;;  %2027 = vmatprep.subr.mxu1 %v3886_v54 }
  0x7b   :  { %1999 = vmatpush3.msra.mxu0 %v2848_v56  ;;  %2028 = vmatpush3.msra.mxu1 %v3887_v48 }
  0x7c   :  { %2000 = vmatprep.subr.mxu0 %v2859_v61  ;;  %2029 = vmatprep.subr.mxu1 %v3888_v57 }
  0x7d   :  { %2001 = vmatpush3.msra.mxu0 %v2868_v53  ;;  %2030 = vmatpush3.msra.mxu1 %v3889_v60  ;;  %v3893_v60 = vand.u32 4294901760, %v2525_v27  ;;  %v3900_v27 = vand.u32 4294901760, %v2567_v44  ;;  %v3906_v44 = vand.u32 4294901760, %v2630_v42  ;;  %v89_v42 = vld [vmem:[#allocation7 + $0x78] sm:$0xff] }
  0x7e   :  { %2002 = vmatprep.subr.mxu0 %v2885_v46  ;;  %2031 = vmatprep.subr.mxu1 %v3890_v55  ;;  %v3895_v55 = vld [vmem:[#allocation32_spill] sm:$0xff] }
  0x7f   :  { %2003 = vmatpush3.msra.mxu0 %v2893_v2  ;;  %2032 = vmatpush3.msra.mxu1 %v3891_v33  ;;  %v3894_v33 = vand.u32 4294901760, %v2531_v29  ;;  %v3901_v29 = vand.u32 4294901760, %v2581_v49  ;;  %v3907_v49 = vand.u32 4294901760, %v2641_v52  ;;  %v3912_v52 = vand.u32 4294901760, %v2713_v59 }
  0x80   :  { %2004 = vmatprep.subr.mxu0 %v2908_v32  ;;  %2033 = vmatprep.subr.mxu1 %v2723_v23  ;;  %v3896_v23 = vand.u32 4294901760, %v2545_v35  ;;  %v3902_v35 = vand.u32 4294901760, %v2871_v47  ;;  %v86_v47 = vld [vmem:[#allocation7 + $0x60] sm:$0xff] }
  0x81   :  { %2005 = vmatpush3.msra.mxu0 %v2915_v37  ;;  %2034 = vmatpush3.msra.mxu1 %v2734_v5  ;;  %v3897_v37 = vld [vmem:[#allocation33_spill] sm:$0xff]  ;;  %v3898_v5 = vand.u32 4294901760, %v2554_v39  ;;  %v3905_v39 = vand.u32 4294901760, %v2619_v10  ;;  %v3909_v10 = vand.u32 4294901760, %v2667_v4  ;;  %v87_v4 = vld [vmem:[#allocation7 + $0x68] sm:$0xff] }
  0x82   :  { %626 = vmatmul.mubr.f32.vlgmr.msra.gmra.mxu0 %v2863_v38  ;;  %2044 = vmatprep.subr.mxu0 %v3892_v41  ;;  %v102_v41 = vld [vmem:[#allocation7 + $0xe0] sm:$0xff] }
  0x83   :  { %2045 = vmatpush3.msra.mxu0 %v3893_v60  ;;  %2035 = vmatprep.subr.mxu1 %v2747_v50 }
  0x84   :  { %2046 = vmatprep.subr.mxu0 %v3894_v33  ;;  %2036 = vmatpush3.msra.mxu1 %v3895_v55  ;;  %v101_v33 = vld [vmem:[#allocation7 + $0xd8] sm:$0xff] }
  0x85   :  { %2047 = vmatpush3.msra.mxu0 %v3896_v23  ;;  %2037 = vmatprep.subr.mxu1 %v3897_v37  ;;  %v3903_v23 = vand.u32 4294901760, %v2607_v63  ;;  %v3908_v63 = vand.u32 4294901760, %v2653_v58  ;;  %v104_v58 = vld [vmem:[#allocation7 + $0xf0] sm:$0xff] }
  0x86   :  { %2048 = vmatprep.subr.mxu0 %v3898_v5  ;;  %2038 = vmatpush3.msra.mxu1 %v3899_v22  ;;  %v3904_v5 = vand.u32 4294901760, %v2863_v38  ;;  %v3919_v38 = vand.u32 4294901760, %v2793_v45  ;;  %v3923_v45 = vand.u32 4294901760, %v2823_v18  ;;  %v84_v18 = vld [vmem:[#allocation7 + $0x50] sm:$0xff] }
  0x87   :  { %2049 = vmatpush3.msra.mxu0 %v3900_v27  ;;  %2039 = vmatprep.subr.mxu1 %v2803_v40  ;;  %v3084_v27 = vand.u32 4294901760, %v86_v47 }
  0x88   :  { %2050 = vmatprep.subr.mxu0 %v3901_v29  ;;  %2040 = vmatpush3.msra.mxu1 %v2819_v0 }
  0x89   :  { %730 = vmatprep.mubr.f32.mxu1 %v3902_v35  ;;  %2051 = vmatpush3.msra.mxu0 %v3903_v23  ;;  %3925 = vst [vmem:[#allocation34_spill] sm:$0xff] %v3084_v27  ;;  %v3929_v23 = vand.u32 4294901760, %v2848_v56  ;;  %v3931_v56 = vand.u32 4294901760, %v2868_v53 }
  0x8a   :  { %734 = vmatmul.mubr.f32.vlgmr.msra.gmra.mxu1 %v3904_v5  ;;  %2052 = vmatprep.subr.mxu0 %v3905_v39  ;;  %v100_v39 = vld [vmem:[#allocation7 + $0xd0] sm:$0xff] }
  0x8b   :  { %2079 = vmatprep.subr.mxu1 %v2492_v7  ;;  %2053 = vmatpush3.msra.mxu0 %v3906_v44  ;;  %v3910_v7 = vand.u32 4294901760, %v2679_v51  ;;  %v3040_v51 = vand.u32 4294901760, %v89_v42  ;;  %v3930_v44 = vand.u32 4294901760, %v2859_v61  ;;  %v3933_v61 = vand.u32 4294901760, %v2885_v46 }
  0x8c   :  { %2080 = vmatpush3.msra.mxu1 %v2494_v8  ;;  %2054 = vmatprep.subr.mxu0 %v3907_v49  ;;  %v3911_v8 = vand.u32 4294901760, %v2700_v3 }
  0x8d   :  { %2081 = vmatprep.subr.mxu1 %v2496_v9  ;;  %2055 = vmatpush3.msra.mxu0 %v3908_v63  ;;  %v105_v9 = vld [vmem:[#allocation7 + $0xf8] sm:$0xff] }
  0x8e   :  { %2082 = vmatpush3.msra.mxu1 %v2498_v13  ;;  %2056 = vmatprep.subr.mxu0 %v3909_v10  ;;  %v88_v13 = vld [vmem:[#allocation7 + $0x70] sm:$0xff]  ;;  %v3045_v3 = vand.u32 4294901760, %v105_v9  ;;  %v3118_v10 = vand.u32 4294901760, %v84_v18 }
  0x8f   :  { %2083 = vmatprep.subr.mxu1 %v2500_v14  ;;  %2057 = vmatpush3.msra.mxu0 %v3910_v7  ;;  %v3913_v14 = vand.u32 4294901760, %v2731_v43  ;;  %v3050_v59 = vand.u32 4294901760, %v88_v13  ;;  %v3917_v43 = vand.u32 4294901760, %v2767_v31  ;;  %v3068_v31 = vand.u32 4294901760, %v87_v4  ;;  %v99_v7 = vld [vmem:[#allocation7 + $0xc8] sm:$0xff] }
  0x90   :  { %2084 = vmatpush3.msra.mxu1 %v2502_v15  ;;  %2058 = vmatprep.subr.mxu0 %v3911_v8  ;;  %v3914_v15 = vand.u32 4294901760, %v2744_v17  ;;  %v3918_v17 = vand.u32 4294901760, %v3881_v1  ;;  %v3071_v60 = vsub.f32 %v105_v9, %v3045_v3  ;;  %3932 = vst [vmem:[#allocation21_spill] sm:$0xff] %v3118_v10  ;;  %v3134_v8 = vand.u32 4294901760, %v100_v39 }
  0x91   :  { %2085 = vmatprep.subr.mxu1 %v2505_v19  ;;  %2059 = vmatpush3.msra.mxu0 %v3912_v52  ;;  %v3915_v19 = vand.u32 4294901760, %v3878_v6  ;;  %3916 = vst [vmem:[#allocation16_spill] sm:$0xff] %v3050_v59  ;;  %3921 = vst [vmem:[#allocation17_spill] sm:$0xff] %v3068_v31  ;;  %v3922_v6 = vand.u32 4294901760, %v2812_v25  ;;  %v3077_v1 = vsub.f32 %v88_v13, %v3050_v59  ;;  %v3926_v25 = vand.u32 4294901760, %v2838_v16 }
  0x92   :  { %2086 = vmatpush3.msra.mxu1 %v2507_v20  ;;  %2060 = vmatprep.subr.mxu0 %v3913_v14  ;;  %v103_v20 = vld [vmem:[#allocation7 + $0xe8] sm:$0xff]  ;;  %v3101_v5 = vsub.f32 %v87_v4, %v3068_v31  ;;  %3934 = vst [vmem:[#allocation22_spill] sm:$0xff] %v3134_v8  ;;  %v3936_v14 = vld [vmem:[#allocation26_spill] sm:$0xff] }
  0x93   :  { %2087 = vmatprep.subr.mxu1 %v2509_v21  ;;  %2061 = vmatpush3.msra.mxu0 %v3914_v15  ;;  %v3055_v21 = vand.u32 4294901760, %v104_v58  ;;  %v3776_v49 = vand.u32 4294901760, %v3077_v1  ;;  %v3941_v4 = vld [vmem:[#allocation38_spill] sm:$0xff] }
  0x94   :  { %2088 = vmatpush3.msra.mxu1 %v2522_v26  ;;  %2062 = vmatprep.subr.mxu0 %v3915_v19  ;;  %v3061_v26 = vsub.f32 %v89_v42, %v3040_v51  ;;  %v83_v42 = vld [vmem:[#allocation7 + $0x48] sm:$0xff]  ;;  %v3774_v13 = vand.u32 4294901760, %v3101_v5  ;;  %v98_v19 = vld [vmem:[#allocation7 + $0xc0] sm:$0xff] }
  0x95   :  { %2089 = vmatprep.subr.mxu1 %v2528_v28  ;;  %2063 = vmatpush3.msra.mxu0 %v3917_v43  ;;  %v3066_v28 = vand.u32 4294901760, %v103_v20  ;;  %v3087_v29 = vsub.f32 %v104_v58, %v3055_v21  ;;  %v3937_v58 = vand.u32 4294901760, %v2908_v32  ;;  %v3159_v15 = vand.u32 4294901760, %v83_v42 }
  0x96   :  { %2090 = vmatpush3.msra.mxu1 %v3877_v11  ;;  %2064 = vmatprep.subr.mxu0 %v3918_v17  ;;  %v85_v11 = vld [vmem:[#allocation7 + $0x58] sm:$0xff]  ;;  %v3942_v43 = vand.u32 4294901760, %v3941_v4  ;;  %v3170_v17 = vsub.f32 %v84_v18, %v3118_v10  ;;  %v3182_v18 = vsub.f32 %v100_v39, %v3134_v8 }
  0x97   :  { %2091 = vmatprep.subr.mxu1 %v3879_v62  ;;  %2065 = vmatpush3.msra.mxu0 %v3919_v38  ;;  %3920 = vst [vmem:[#allocation31_spill] sm:$0xff] %v3066_v28  ;;  %v3082_v62 = vand.u32 4294901760, %v102_v41  ;;  %v3094_v35 = vand.u32 4294901760, %v85_v11  ;;  %v3105_v16 = vsub.f32 %v103_v20, %v3066_v28  ;;  %v3779_v63 = vand.u32 4294901760, %v3087_v29  ;;  %3939 = vst [vmem:[#allocation24_spill] sm:$0xff] %v3159_v15  ;;  %v3940_v20 = vld [vmem:[#allocation27_spill] sm:$0xff] }
  0x98   :  { %2092 = vmatpush3.msra.mxu1 %v3880_v24  ;;  %2066 = vmatprep.subr.mxu0 %v3922_v6  ;;  %v3092_v24 = vand.u32 4294901760, %v101_v33  ;;  %3943 = vst [vmem:[#allocation25_spill] sm:$0xff] %v3170_v17  ;;  %v3945_v6 = vld [vmem:[#allocation28_spill] sm:$0xff]  ;;  %v3949_v39 = vld [vmem:[#allocation30_spill] sm:$0xff] }
  0x99   :  { %2093 = vmatprep.subr.mxu1 %v3882_v36  ;;  %2067 = vmatpush3.msra.mxu0 %v3923_v45  ;;  %3924 = vst [vmem:[#allocation18_spill] sm:$0xff] %v3082_v62  ;;  %3928 = vst [vmem:[#allocation20_spill] sm:$0xff] %v3094_v35  ;;  %v3780_v36 = vand.u32 4294901760, %v3061_v26  ;;  %v3127_v53 = vsub.f32 %v85_v11, %v3094_v35  ;;  %v3775_v52 = vand.u32 4294901760, %v3105_v16  ;;  %v3944_v11 = vld [vmem:[#allocation37_spill] sm:$0xff]  ;;  %v78_v45 = vld [vmem:[#allocation7 + $0x20] sm:$0xff] }
  0x9a   :  { %2094 = vmatpush3.msra.mxu1 %v3883_v34  ;;  %2068 = vmatprep.subr.mxu0 %v3926_v25  ;;  %3927 = vst [vmem:[#allocation19_spill] sm:$0xff] %v3092_v24  ;;  %v3781_v34 = vand.u32 4294901760, %v3071_v60  ;;  %v3137_v9 = vsub.f32 %v101_v33, %v3092_v24  ;;  %v3167_v32 = vsub.f32 %v3087_v29, %v3779_v63  ;;  %v81_v33 = vld [vmem:[#allocation7 + $0x38] sm:$0xff]  ;;  %v80_v63 = vld [vmem:[#allocation7 + $0x30] sm:$0xff] }
  0x9b   :  { %2095 = vmatprep.subr.mxu1 %v3884_v12  ;;  %2069 = vmatpush3.msra.mxu0 %v3929_v23  ;;  %v3115_v12 = vsub.f32 %v86_v47, %v3084_v27  ;;  %v82_v47 = vld [vmem:[#allocation7 + $0x40] sm:$0xff]  ;;  %v3177_v25 = vld [vmem:[#allocation7 + $0xb8] sm:$0xff] }
  0x9c   :  { %2096 = vmatpush3.msra.mxu1 %v3885_v30  ;;  %2070 = vmatprep.subr.mxu0 %v3930_v44  ;;  %v3121_v30 = vsub.f32 %v102_v41, %v3082_v62  ;;  %v3145_v46 = vsub.f32 %v3071_v60, %v3781_v34  ;;  %v3782_v23 = vand.u32 4294901760, %v3137_v9  ;;  %v3783_v44 = vand.u32 4294901760, %v3127_v53 }
  0x9d   :  { %2097 = vmatprep.subr.mxu1 %v3886_v54  ;;  %2071 = vmatpush3.msra.mxu0 %v3931_v56  ;;  %v3132_v54 = vsub.f32 %v3061_v26, %v3780_v36  ;;  %v3778_v38 = vand.u32 4294901760, %v3115_v12  ;;  %v3946_v56 = vld [vmem:[#allocation36_spill] sm:$0xff] }
  0x9e   :  { %2098 = vmatpush3.msra.mxu1 %v3887_v48  ;;  %2072 = vmatprep.subr.mxu0 %v3933_v61  ;;  %v3935_v48 = vand.u32 4294901760, %v2893_v2  ;;  %v3157_v2 = vand.u32 4294901760, %v99_v7  ;;  %v3777_v41 = vand.u32 4294901760, %v3121_v30  ;;  %v3947_v61 = vld [vmem:[#allocation29_spill] sm:$0xff]  ;;  %v3238_v36 = vld [vmem:[#allocation7 + $0xa8] sm:$0xff] }
  0x9f   :  { %2099 = vmatprep.subr.mxu1 %v3888_v57  ;;  %v3155_v57 = vsub.f32 %v3077_v1, %v3776_v49  ;;  %900 = vmatprep.mubr.f32.mxu0 %v3944_v11  ;;  %v96_v49 = vld [vmem:[#allocation7 + $0xb0] sm:$0xff] }
  0xa0   :  { %2073 = vmatpush3.msra.mxu0 %v3935_v48  ;;  %2100 = vmatpush3.msra.mxu1 %v3936_v14  ;;  %3938 = vst [vmem:[#allocation23_spill] sm:$0xff] %v3157_v2  ;;  %v3190_v14 = vsub.f32 %v3105_v16, %v3775_v52  ;;  %v3215_v52 = vsub.f32 %v3121_v30, %v3777_v41  ;;  %v3266_v48 = vand.u32 4294901760, %v80_v63 }
  0xa1   :  { %2074 = vmatprep.subr.mxu0 %v3937_v58  ;;  %2101 = vmatprep.subr.mxu1 %v3940_v20  ;;  %v3195_v58 = vsub.f32 %v3101_v5, %v3774_v13  ;;  %v3197_v20 = vand.u32 4294901760, %v98_v19  ;;  %v3235_v41 = vsub.f32 %v3127_v53, %v3783_v44  ;;  %v3241_v34 = vsub.f32 %v99_v7, %v3157_v2 }
  0xa2   :  { %2075 = vmatpush3.msra.mxu0 %v3942_v43  ;;  %2102 = vmatpush3.msra.mxu1 %v3945_v6  ;;  %v3203_v43 = vsub.f32 %v83_v42, %v3159_v15  ;;  %v3205_v6 = vand.u32 4294901760, %v82_v47  ;;  %v3220_v42 = vsub.f32 %v3115_v12, %v3778_v38  ;;  %v3788_v38 = vand.u32 4294901760, %v3182_v18 }
  0xa3   :  { %902 = vmatmul.mubr.f32.vlgmr.msra.gmra.mxu0 %v3946_v56  ;;  %2103 = vmatprep.subr.mxu1 %v3947_v61  ;;  %3948 = vst [vmem:[#allocation32_spill] sm:$0xff] %v3197_v20  ;;  %v3207_v61 = vand.u32 4294901760, %v81_v33  ;;  %v3249_v44 = vsub.f32 %v98_v19, %v3197_v20  ;;  %v94_v19 = vld [vmem:[#allocation7 + $0xa0] sm:$0xff] }
  0xa4   :  { %2114 = vmatprep.subr.mxu0 %v3045_v3  ;;  %2104 = vmatpush3.msra.mxu1 %v3949_v39  ;;  %3950 = vst [vmem:[#allocation33_spill] sm:$0xff] %v3203_v43  ;;  %3951 = vst [vmem:[#allocation35_spill] sm:$0xff] %v3205_v6  ;;  %v3223_v39 = vand.u32 4294901760, %v3177_v25  ;;  %v3254_v7 = vsub.f32 %v82_v47, %v3205_v6  ;;  %v3269_v47 = vand.u32 4294901760, %v3238_v36 }
  0xa5   :  { %2115 = vmatpush3.msra.mxu0 %v3040_v51  ;;  %2105 = vmatprep.subr.mxu1 %v2747_v50  ;;  %v3230_v50 = vsub.f32 %v3137_v9, %v3782_v23  ;;  %v3257_v13 = vsub.f32 %v81_v33, %v3207_v61  ;;  %v72_v33 = vld [vmem:[#allocation2] sm:$0x3] }
  0xa6   :  { %3952 = vst [vmem:[#allocation26_spill] sm:$0xff] %v3223_v39  ;;  %2116 = vmatprep.subr.mxu0 %v3055_v21  ;;  %2106 = vmatpush3.msra.mxu1 %v3895_v55  ;;  %v79_v55 = vld [vmem:[#allocation7 + $0x28] sm:$0xff]  ;;  %3955 = vst [vmem:[#allocation37_spill] sm:$0xff] %v3269_v47 }
  0xa7   :  { %2117 = vmatpush3.msra.mxu0 %v3050_v59  ;;  %2107 = vmatprep.subr.mxu1 %v3897_v37  ;;  %3953 = vst [vmem:[#allocation27_spill] sm:$0xff] %v3257_v13  ;;  %v3259_v37 = vand.u32 4294901760, %v96_v49  ;;  %v3288_v23 = vand.u32 4294901760, %v79_v55 }
  0xa8   :  { %2118 = vmatprep.subr.mxu0 %v3066_v28  ;;  %2108 = vmatpush3.msra.mxu1 %v3899_v22  ;;  %v3961_v28 = vld [vmem:[#allocation15_spill] sm:$0xff] }
  0xa9   :  { %3954 = vst [vmem:[#allocation38_spill] sm:$0xff] %v3259_v37  ;;  %2119 = vmatpush3.msra.mxu0 %v3068_v31  ;;  %2109 = vmatprep.subr.mxu1 %v2803_v40  ;;  %v3278_v40 = vsub.f32 %v3182_v18, %v3788_v38  ;;  %3957 = vst [vmem:[#allocation28_spill] sm:$0xff] %v3288_v23  ;;  %v3291_v31 = vand.u32 4294901760, %v78_v45  ;;  %v77_v38 = vld [vmem:[#allocation7 + $0x18] sm:$0xff]  ;;  %v3962_v4 = vsub.s32 1, %v3961_v28 }
  0xaa   :  { %2120 = vmatprep.subr.mxu0 %v3082_v62  ;;  %2110 = vmatpush3.msra.mxu1 %v2819_v0  ;;  %v3956_v62 = vand.u32 4294901760, %v3170_v17 }
  0xab   :  { %1004 = vmatprep.mubr.f32.mxu1 %v3944_v11  ;;  %2121 = vmatpush3.msra.mxu0 %v3084_v27  ;;  %3958 = vst [vmem:[#allocation36_spill] sm:$0xff] %v3291_v31  ;;  %v3959_v11 = vand.u32 4294901760, %v3203_v43  ;;  %v1019_v59 = vrot.slane %v72_v33, %v3962_v4  ;;  %v3964_v27 = vsub.s32 0, %v3961_v28  ;;  %v3968_v28 = vand.u32 4294901760, %v3167_v32 }
  0xac   :  { %v3286_v0 = vsub.f32 %v3170_v17, %v3956_v62  ;;  %1006 = vmatmul.mubr.f32.vlgmr.msra.gmra.mxu1 %v3946_v56  ;;  %2122 = vmatprep.subr.mxu0 %v3092_v24  ;;  %v3303_v62 = vsub.f32 %v3177_v25, %v3223_v39  ;;  %v3963_v17 = vand.u32 4294901760, %v3145_v46  ;;  %v3311_v56 = vsub.f32 %v80_v63, %v3266_v48  ;;  %v93_v63 = vld [vmem:[#allocation7 + $0x98] sm:$0xff] }
  0xad   :  { %v3298_v22 = vsub.f32 %v3203_v43, %v3959_v11  ;;  %2123 = vmatpush3.msra.mxu0 %v3094_v35  ;;  %v3313_v24 = vand.u32 4294901760, %v94_v19  ;;  %v1015_v43 = vrot.slane %v72_v33, %v3964_v27  ;;  %v3965_v25 = vand.u32 4294901760, %v3132_v54 }
  0xae   :  { %3960 = vst [vmem:[#allocation29_spill] sm:$0xff] %v3303_v62  ;;  %2149 = vmatprep.subr.mxu1 %v3963_v17  ;;  %2124 = vmatprep.subr.mxu0 %v3134_v8  ;;  %v1286_v46 = vand.u32 4294901760, %v3278_v40  ;;  %v3966_v17 = vand.u32 4294901760, %v3241_v34  ;;  %v3327_v35 = vand.u32 4294901760, %v77_v38  ;;  %v3330_v11 = vsub.f32 %v96_v49, %v3259_v37  ;;  %v76_v49 = vld [vmem:[#allocation7 + $0x10] sm:$0xff] }
  0xaf   :  { %2150 = vmatpush3.msra.mxu1 %v3965_v25  ;;  %2125 = vmatpush3.msra.mxu0 %v3118_v10  ;;  %v1174_v27 = vand.u32 4294901760, %v3286_v0  ;;  %v3337_v54 = vsub.f32 %v79_v55, %v3288_v23  ;;  %v3969_v33 = vand.u32 4294901760, %v3249_v44  ;;  %v3345_v25 = vsub.f32 %v78_v45, %v3291_v31 }
  0xb0   :  { %v3325_v4 = vsub.f32 %v3241_v34, %v3966_v17  ;;  %3967 = vst [vmem:[#allocation30_spill] sm:$0xff] %v3327_v35  ;;  %2151 = vmatprep.subr.mxu1 %v3968_v28  ;;  %v3970_v17 = vand.u32 4294901760, %v3155_v57  ;;  %2126 = vmatprep.subr.mxu0 %v3157_v2  ;;  %v3971_v0 = vand.u32 4294901760, %v3254_v7  ;;  %v3357_v10 = vand.u32 4294901760, %v1019_v59  ;;  %v91_v2 = vld [vmem:[#allocation7 + $0x88] sm:$0xff] }
  0xb1   :  { %v3342_v40 = vsub.f32 %v3249_v44, %v3969_v33  ;;  %v92_v33 = vld [vmem:[#allocation7 + $0x90] sm:$0xff]  ;;  %v3973_v45 = vand.u32 4294901760, %v3190_v14  ;;  %2127 = vmatpush3.msra.mxu0 %v3159_v15  ;;  %v3362_v57 = vand.u32 4294901760, %v93_v63  ;;  %v3373_v28 = vand.u32 4294901760, %v1015_v43 }
  0xb2   :  { %2152 = vmatpush3.msra.mxu1 %v3970_v17  ;;  %v3354_v55 = vsub.f32 %v3254_v7, %v3971_v0  ;;  %3972 = vst [vmem:[#allocation15_spill] sm:$0xff] %v3357_v10  ;;  %v3975_v17 = vand.u32 4294901760, %v3257_v13  ;;  %v3371_v0 = vsub.f32 %v3238_v36, %v3269_v47  ;;  %v3977_v8 = vand.u32 4294901760, %v3195_v58  ;;  %2128 = vmatprep.subr.mxu0 %v3197_v20  ;;  %v75_v20 = vld [vmem:[#allocation7 + $0x8] sm:$0xff] }
  0xb3   :  { %2153 = vmatprep.subr.mxu1 %v3973_v45  ;;  %3974 = vst [vmem:[#allocation39_spill] sm:$0xff] %v3362_v57  ;;  %3976 = vst [vmem:[#allocation40_spill] sm:$0xff] %v3373_v28  ;;  %v1293_v14 = vand.u32 4294901760, %v3325_v4  ;;  %v3380_v45 = vsub.f32 %v77_v38, %v3327_v35  ;;  %v3383_v15 = vand.u32 4294901760, %v76_v49  ;;  %2129 = vmatpush3.msra.mxu0 %v3205_v6  ;;  %v1300_v36 = vand.u32 4294901760, %v3342_v40  ;;  %v90_v6 = vld [vmem:[#allocation7 + $0x80] sm:$0xff] }
  0xb4   :  { %v3367_v32 = vsub.f32 %v3257_v13, %v3975_v17  ;;  %2154 = vmatpush3.msra.mxu1 %v3977_v8  ;;  %v3978_v13 = vand.u32 4294901760, %v3215_v52  ;;  %v3389_v58 = vand.u32 4294901760, %v92_v33  ;;  %v3393_v4 = vsub.f32 %v94_v19, %v3313_v24  ;;  %2130 = vmatprep.subr.mxu0 %v3223_v39 }
  0xb5   :  { %v3980_v38 = vand.u32 4294901760, %v3220_v42  ;;  %v1188_v52 = vand.u32 4294901760, %v3354_v55  ;;  %v3402_v40 = vand.u32 4294901760, %v91_v2  ;;  %v3405_v8 = vsub.f32 %v1019_v59, %v3357_v10  ;;  %2131 = vmatpush3.msra.mxu0 %v3207_v61  ;;  %v74_v55 = vld [vmem:[#allocation7] sm:$0xff]  ;;  %1359 = vmatprep.mubr.f32.mxu1 %v3357_v10 }
  0xb6   :  { %2155 = vmatprep.subr.mxu1 %v3978_v13  ;;  %3979 = vst [vmem:[#allocation41_spill] sm:$0xff] %v3389_v58  ;;  %v3981_v13 = vand.u32 4294901760, %v3303_v62  ;;  %v3982_v19 = vand.u32 4294901760, %v3230_v50  ;;  %v1195_v42 = vand.u32 4294901760, %v3367_v32  ;;  %v3413_v39 = vsub.f32 %v1015_v43, %v3373_v28  ;;  %2132 = vmatprep.subr.mxu0 %v3259_v37 }
  0xb7   :  { %2156 = vmatpush3.msra.mxu1 %v3980_v38  ;;  %v3984_v59 = vand.u32 4294901760, %v3330_v11  ;;  %v3425_v32 = vsub.f32 %v76_v49, %v3383_v15  ;;  %2133 = vmatpush3.msra.mxu0 %v3266_v48  ;;  %v3441_v37 = vand.u32 4294901760, %v74_v55 }
  0xb8   :  { %v1306_v17 = vsub.f32 %v3303_v62, %v3981_v13  ;;  %2157 = vmatprep.subr.mxu1 %v3982_v19  ;;  %v3416_v13 = vsub.f32 %v93_v63, %v3362_v57  ;;  %v3983_v62 = vand.u32 4294901760, %v3235_v41  ;;  %v3427_v19 = vand.u32 4294901760, %v75_v20  ;;  %2134 = vmatprep.subr.mxu0 %v3269_v47 }
  0xb9   :  { %v1313_v50 = vsub.f32 %v3330_v11, %v3984_v59  ;;  %v3985_v63 = vand.u32 4294901760, %v3311_v56  ;;  %v3438_v59 = vsub.f32 %v92_v33, %v3389_v58  ;;  %2135 = vmatpush3.msra.mxu0 %v3288_v23  ;;  %v3452_v47 = vsub.f32 %v91_v2, %v3402_v40 }
  0xba   :  { %2158 = vmatpush3.msra.mxu1 %v3983_v62  ;;  %v3434_v62 = vand.u32 4294901760, %v90_v6  ;;  %v1307_v49 = vand.u32 4294901760, %v1306_v17  ;;  %v3987_v17 = vand.u32 4294901760, %v3298_v22  ;;  %2136 = vmatprep.subr.mxu0 %v3313_v24  ;;  %v4023_v10 = vld [vmem:[#allocation39_spill] sm:$0xff] }
  0xbb   :  { %2159 = vmatprep.subr.mxu1 %v1286_v46  ;;  %v1201_v41 = vsub.f32 %v3311_v56, %v3985_v63  ;;  %v3986_v63 = vand.u32 4294901760, %v3371_v0  ;;  %v1314_v43 = vand.u32 4294901760, %v1313_v50  ;;  %v3989_v46 = vand.u32 4294901760, %v3337_v54  ;;  %2137 = vmatpush3.msra.mxu0 %v3291_v31 }
  0xbc   :  { %2160 = vmatpush3.msra.mxu1 %v1174_v27  ;;  %v3990_v27 = vand.u32 4294901760, %v3393_v4  ;;  %v3470_v50 = vsub.f32 %v90_v6, %v3434_v62  ;;  %2138 = vmatprep.subr.mxu0 %v3362_v57 }
  0xbd   :  { %2161 = vmatprep.subr.mxu1 %v1293_v14  ;;  %v1320_v38 = vsub.f32 %v3371_v0, %v3986_v63  ;;  %v3458_v14 = vsub.f32 %v75_v20, %v3427_v19  ;;  %v1208_v63 = vsub.f32 %v3337_v54, %v3989_v46  ;;  %v1202_v2 = vand.u32 4294901760, %v1201_v41  ;;  %2139 = vmatpush3.msra.mxu0 %v3327_v35 }
  0xbe   :  { %2162 = vmatpush3.msra.mxu1 %v3987_v17  ;;  %v1327_v22 = vsub.f32 %v3393_v4, %v3990_v27  ;;  %3991 = vst [vmem:[#allocation43_spill] sm:$0xff] %v3470_v50  ;;  %v3474_v20 = vsub.f32 %v74_v55, %v3441_v37  ;;  %v3994_v41 = vand.u32 4294901760, %v3345_v25  ;;  %v3996_v55 = vand.u32 4294901760, %v3416_v13  ;;  %2140 = vmatprep.subr.mxu0 %v3389_v58 }
  0xbf   :  { %3988 = vst [vmem:[#allocation42_spill] sm:$0xff] %v3458_v14  ;;  %2163 = vmatprep.subr.mxu1 %v1300_v36  ;;  %v3993_v36 = vand.u32 4294901760, %v3405_v8  ;;  %v1321_v6 = vand.u32 4294901760, %v1320_v38  ;;  %v3997_v27 = vand.u32 4294901760, %v3380_v45  ;;  %2141 = vmatpush3.msra.mxu0 %v3383_v15  ;;  %v3998_v35 = vand.u32 4294901760, %v3438_v59 }
  0xc0   :  { %2164 = vmatpush3.msra.mxu1 %v1188_v52  ;;  %3992 = vst [vmem:[#allocation44_spill] sm:$0xff] %v3474_v20  ;;  %v1215_v33 = vsub.f32 %v3345_v25, %v3994_v41  ;;  %v3995_v52 = vand.u32 4294901760, %v3413_v39  ;;  %v1334_v57 = vsub.f32 %v3416_v13, %v3996_v55  ;;  %v1209_v41 = vand.u32 4294901760, %v1208_v63  ;;  %2142 = vmatprep.subr.mxu0 %v3402_v40 }
  0xc1   :  { %v1121_v46 = vsub.f32 %v3405_v8, %v3993_v36  ;;  %2165 = vmatprep.subr.mxu1 %v1307_v49  ;;  %v1222_v49 = vsub.f32 %v3380_v45, %v3997_v27  ;;  %v1341_v55 = vsub.f32 %v3438_v59, %v3998_v35  ;;  %v3999_v58 = vand.u32 4294901760, %v3425_v32  ;;  %2143 = vmatpush3.msra.mxu0 %v3427_v19 }
  0xc2   :  { %v1127_v17 = vsub.f32 %v3413_v39, %v3995_v52  ;;  %2166 = vmatpush3.msra.mxu1 %v1195_v42  ;;  %v1328_v52 = vand.u32 4294901760, %v1327_v22  ;;  %v1216_v63 = vand.u32 4294901760, %v1215_v33  ;;  %v1335_v38 = vand.u32 4294901760, %v1334_v57  ;;  %2144 = vmatprep.subr.mxu0 %v3434_v62 }
  0xc3   :  { %2167 = vmatprep.subr.mxu1 %v1314_v43  ;;  %v1122_v42 = vand.u32 4294901760, %v1121_v46  ;;  %v1229_v27 = vsub.f32 %v3425_v32, %v3999_v58  ;;  %v3831_v43 = vand.u32 4294901760, %v3474_v20  ;;  %v4000_v35 = vand.u32 4294901760, %v3452_v47  ;;  %2145 = vmatpush3.msra.mxu0 %v3441_v37 }
  0xc4   :  { %2168 = vmatpush3.msra.mxu1 %v1202_v2  ;;  %v1128_v22 = vand.u32 4294901760, %v1127_v17  ;;  %v1223_v2 = vand.u32 4294901760, %v1222_v49  ;;  %v4001_v33 = vand.u32 4294901760, %v3458_v14  ;;  %v1342_v58 = vand.u32 4294901760, %v1341_v55  ;;  %2184 = vmatprep.subr.mxu0 %v3071_v60 }
  0xc5   :  { %2169 = vmatprep.subr.mxu1 %v1321_v6  ;;  %v1348_v36 = vsub.f32 %v3452_v47, %v4000_v35  ;;  %v4002_v6 = vand.u32 4294901760, %v3470_v50  ;;  %1123 = vmatprep.mubr.f32.mxu0 %v1122_v42  ;;  %v1230_v17 = vand.u32 4294901760, %v1229_v27  ;;  %v4006_v27 = vld [vmem:[#allocation33_spill] sm:$0xff]  ;;  %v4008_v35 = vld [vmem:[#allocation18_spill] sm:$0xff] }
  0xc6   :  { %2170 = vmatpush3.msra.mxu1 %v1209_v41  ;;  %v1236_v46 = vsub.f32 %v3458_v14, %v4001_v33  ;;  %v1243_v41 = vsub.f32 %v3474_v20, %v3831_v43  ;;  %1129 = vmatmul.mubr.f32.vlgmr.msra.gmra.mxu0 %v1128_v22  ;;  %v4007_v22 = vld [vmem:[#allocation17_spill] sm:$0xff]  ;;  %v4021_v43 = vld [vmem:[#allocation38_spill] sm:$0xff] }
  0xc7   :  { %2171 = vmatprep.subr.mxu1 %v1328_v52  ;;  %v1355_v57 = vsub.f32 %v3470_v50, %v4002_v6  ;;  %v1349_v49 = vand.u32 4294901760, %v1348_v36  ;;  %2185 = vmatpush3.msra.mxu0 %v3061_v26  ;;  %v4003_v36 = vld [vmem:[#allocation25_spill] sm:$0xff]  ;;  %v4013_v6 = vld [vmem:[#allocation20_spill] sm:$0xff] }
  0xc8   :  { %2172 = vmatpush3.msra.mxu1 %v1216_v63  ;;  %v1237_v52 = vand.u32 4294901760, %v1236_v46  ;;  %2186 = vmatprep.subr.mxu0 %v3087_v29  ;;  %v1244_v42 = vand.u32 4294901760, %v1243_v41  ;;  %v4005_v63 = vld [vmem:[#allocation31_spill] sm:$0xff]  ;;  %v4010_v33 = vld [vmem:[#allocation29_spill] sm:$0xff] }
  0xc9   :  { %2173 = vmatprep.subr.mxu1 %v1335_v38  ;;  %v1356_v55 = vand.u32 4294901760, %v1355_v57  ;;  %2187 = vmatpush3.msra.mxu0 %v3077_v1  ;;  %v4004_v38 = vld [vmem:[#allocation16_spill] sm:$0xff]  ;;  %v4011_v46 = vld [vmem:[#allocation19_spill] sm:$0xff]  ;;  %v4014_v57 = vld [vmem:[#allocation22_spill] sm:$0xff] }
  0xca   :  { %2174 = vmatpush3.msra.mxu1 %v1223_v2  ;;  %2188 = vmatprep.subr.mxu0 %v3105_v16  ;;  %v4009_v2 = vld [vmem:[#allocation34_spill] sm:$0xff]  ;;  %v4016_v41 = vld [vmem:[#allocation23_spill] sm:$0xff] }
  0xcb   :  { %2175 = vmatprep.subr.mxu1 %v1342_v58  ;;  %2189 = vmatpush3.msra.mxu0 %v3101_v5  ;;  %v4012_v58 = vld [vmem:[#allocation27_spill] sm:$0xff] }
  0xcc   :  { %2176 = vmatpush3.msra.mxu1 %v1230_v17  ;;  %2190 = vmatprep.subr.mxu0 %v3121_v30  ;;  %v4015_v17 = vld [vmem:[#allocation21_spill] sm:$0xff] }
  0xcd   :  { %2177 = vmatprep.subr.mxu1 %v1349_v49  ;;  %2191 = vmatpush3.msra.mxu0 %v3115_v12  ;;  %v4017_v49 = vld [vmem:[#allocation24_spill] sm:$0xff] }
  0xce   :  { %2178 = vmatpush3.msra.mxu1 %v1237_v52  ;;  %2192 = vmatprep.subr.mxu0 %v3137_v9  ;;  %v4018_v52 = vld [vmem:[#allocation32_spill] sm:$0xff] }
  0xcf   :  { %2179 = vmatprep.subr.mxu1 %v1356_v55  ;;  %2193 = vmatpush3.msra.mxu0 %v3127_v53  ;;  %v4019_v55 = vld [vmem:[#allocation35_spill] sm:$0xff] }
  0xd0   :  { %2180 = vmatpush3.msra.mxu1 %v1244_v42  ;;  %2194 = vmatprep.subr.mxu0 %v3182_v18  ;;  %v4020_v42 = vld [vmem:[#allocation26_spill] sm:$0xff] }
  0xd1   :  { %1361 = vmatmul.mubr.f32.vlgmr.msra.gmra.mxu1 %v3373_v28  ;;  %2219 = vmatprep.subr.mxu1 %v3045_v3  ;;  %v4022_v28 = vld [vmem:[#allocation37_spill] sm:$0xff] }
  0xd2   :  { %2220 = vmatpush3.msra.mxu1 %v3040_v51  ;;  %2195 = vmatpush3.msra.mxu0 %v4003_v36 }
  0xd3   :  { %2221 = vmatprep.subr.mxu1 %v3055_v21  ;;  %2196 = vmatprep.subr.mxu0 %v3241_v34 }
  0xd4   :  { %2222 = vmatpush3.msra.mxu1 %v4004_v38  ;;  %2197 = vmatpush3.msra.mxu0 %v4006_v27 }
  0xd5   :  { %2223 = vmatprep.subr.mxu1 %v4005_v63  ;;  %2198 = vmatprep.subr.mxu0 %v3249_v44 }
  0xd6   :  { %2224 = vmatpush3.msra.mxu1 %v4007_v22  ;;  %2199 = vmatpush3.msra.mxu0 %v3254_v7 }
  0xd7   :  { %2225 = vmatprep.subr.mxu1 %v4008_v35  ;;  %2200 = vmatprep.subr.mxu0 %v4010_v33 }
  0xd8   :  { %2226 = vmatpush3.msra.mxu1 %v4009_v2  ;;  %2201 = vmatpush3.msra.mxu0 %v4012_v58 }
  0xd9   :  { %2227 = vmatprep.subr.mxu1 %v4011_v46  ;;  %2202 = vmatprep.subr.mxu0 %v3330_v11 }
  0xda   :  { %2228 = vmatpush3.msra.mxu1 %v4013_v6  ;;  %2203 = vmatpush3.msra.mxu0 %v3311_v56 }
  0xdb   :  { %2229 = vmatprep.subr.mxu1 %v4014_v57  ;;  %2204 = vmatprep.subr.mxu0 %v3371_v0 }
  0xdc   :  { %2230 = vmatpush3.msra.mxu1 %v4015_v17  ;;  %2205 = vmatpush3.msra.mxu0 %v3337_v54 }
  0xdd   :  { %2231 = vmatprep.subr.mxu1 %v4016_v41  ;;  %2206 = vmatprep.subr.mxu0 %v3393_v4 }
  0xde   :  { %2232 = vmatpush3.msra.mxu1 %v4017_v49  ;;  %2207 = vmatpush3.msra.mxu0 %v3345_v25 }
  0xdf   :  { %2233 = vmatprep.subr.mxu1 %v4018_v52  ;;  %2208 = vmatprep.subr.mxu0 %v3416_v13 }
  0xe0   :  { %2234 = vmatpush3.msra.mxu1 %v4019_v55  ;;  %2209 = vmatpush3.msra.mxu0 %v3380_v45 }
  0xe1   :  { %2235 = vmatprep.subr.mxu1 %v4020_v42  ;;  %2210 = vmatprep.subr.mxu0 %v3438_v59 }
  0xe2   :  { %2236 = vmatpush3.msra.mxu1 %v3207_v61  ;;  %2211 = vmatpush3.msra.mxu0 %v3425_v32 }
  0xe3   :  { %2237 = vmatprep.subr.mxu1 %v4021_v43  ;;  %2212 = vmatprep.subr.mxu0 %v3452_v47 }
  0xe4   :  { %2238 = vmatpush3.msra.mxu1 %v3266_v48  ;;  %2213 = vmatpush3.msra.mxu0 %v3458_v14  ;;  %v4025_v14 = vld [vmem:[#allocation30_spill] sm:$0xff] }
  0xe5   :  { %2239 = vmatprep.subr.mxu1 %v4022_v28  ;;  %2214 = vmatprep.subr.mxu0 %v3470_v50  ;;  %v4024_v28 = vand.u32 4294901760, %v3071_v60  ;;  %v4027_v50 = vld [vmem:[#allocation41_spill] sm:$0xff]  ;;  %v4030_v60 = vand.u32 4294901760, %v3105_v16  ;;  %v4035_v16 = vand.u32 4294901760, %v3413_v39 }
  0xe6   :  { %2240 = vmatpush3.msra.mxu1 %v3288_v23  ;;  %2215 = vmatpush3.msra.mxu0 %v3474_v20  ;;  %v4026_v23 = vand.u32 4294901760, %v3061_v26  ;;  %v4028_v20 = vand.u32 4294901760, %v3087_v29  ;;  %v4031_v26 = vand.u32 4294901760, %v3101_v5  ;;  %v4032_v29 = vand.u32 4294901760, %v3121_v30 }
  0xe7   :  { %2241 = vmatprep.subr.mxu1 %v3313_v24  ;;  %1496 = vmatprep.mubr.f32.mxu0 %v3405_v8  ;;  %v4037_v5 = vand.u32 4294901760, %v3127_v53  ;;  %v4038_v30 = vand.u32 4294901760, %v3182_v18  ;;  %v4045_v53 = vand.u32 4294901760, %v4012_v58  ;;  %v4047_v18 = vand.u32 4294901760, %v3311_v56 }
  0xe8   :  { %2242 = vmatpush3.msra.mxu1 %v3291_v31  ;;  %1499 = vmatmul.mubr.f32.vlgmr.msra.gmra.mxu0 %v3413_v39  ;;  %v4029_v31 = vand.u32 4294901760, %v3077_v1  ;;  %v4033_v1 = vand.u32 4294901760, %v3405_v8  ;;  %v4048_v39 = vand.u32 4294901760, %v3371_v0  ;;  %v4051_v56 = vand.u32 4294901760, %v3345_v25 }
  0xe9   :  { %2243 = vmatprep.subr.mxu1 %v4023_v10  ;;  %2254 = vmatprep.subr.mxu0 %v4024_v28  ;;  %v4052_v28 = vand.u32 4294901760, %v3416_v13  ;;  %v4054_v0 = vand.u32 4294901760, %v3438_v59  ;;  %v4055_v25 = vand.u32 4294901760, %v3425_v32  ;;  %v4056_v8 = vand.u32 4294901760, %v3452_v47  ;;  %v4058_v13 = vld [vmem:[#allocation42_spill] sm:$0xff]  ;;  %v4067_v47 = vld [vmem:[#allocation40_spill] sm:$0xff] }
  0xea   :  { %2244 = vmatpush3.msra.mxu1 %v4025_v14  ;;  %2255 = vmatpush3.msra.mxu0 %v4026_v23  ;;  %v4036_v23 = vand.u32 4294901760, %v3137_v9  ;;  %v4040_v9 = vand.u32 4294901760, %v3241_v34  ;;  %v4044_v34 = vand.u32 4294901760, %v4010_v33 }
  0xeb   :  { %2245 = vmatprep.subr.mxu1 %v4027_v50  ;;  %2256 = vmatprep.subr.mxu0 %v4028_v20  ;;  %v4060_v20 = vld [vmem:[#allocation28_spill] sm:$0xff] }
  0xec   :  { %2246 = vmatpush3.msra.mxu1 %v3383_v15  ;;  %2257 = vmatpush3.msra.mxu0 %v4029_v31  ;;  %v4034_v31 = vand.u32 4294901760, %v3115_v12  ;;  %v4039_v12 = vand.u32 4294901760, %v4003_v36  ;;  %v4065_v36 = vld [vmem:[#allocation15_spill] sm:$0xff] }
  0xed   :  { %2247 = vmatprep.subr.mxu1 %v3402_v40  ;;  %2258 = vmatprep.subr.mxu0 %v4030_v60 }
  0xee   :  { %2248 = vmatpush3.msra.mxu1 %v3427_v19  ;;  %2259 = vmatpush3.msra.mxu0 %v4031_v26 }
  0xef   :  { %2249 = vmatprep.subr.mxu1 %v3434_v62  ;;  %2260 = vmatprep.subr.mxu0 %v4032_v29 }
  0xf0   :  { %2250 = vmatpush3.msra.mxu1 %v3441_v37  ;;  %1603 = vmatprep.mubr.f32.mxu1 %v4033_v1 }
  0xf1   :  { %2261 = vmatpush3.msra.mxu0 %v4034_v31  ;;  %1607 = vmatmul.mubr.f32.vlgmr.msra.gmra.mxu1 %v4035_v16 }
  0xf2   :  { %2262 = vmatprep.subr.mxu0 %v4036_v23  ;;  %2289 = vmatprep.subr.mxu1 %v3045_v3  ;;  %v4041_v3 = vand.u32 4294901760, %v4006_v27 }
  0xf3   :  { %2263 = vmatpush3.msra.mxu0 %v4037_v5  ;;  %2290 = vmatpush3.msra.mxu1 %v3040_v51  ;;  %v4042_v51 = vand.u32 4294901760, %v3249_v44  ;;  %v4046_v44 = vand.u32 4294901760, %v3330_v11  ;;  %v4050_v11 = vand.u32 4294901760, %v3393_v4  ;;  %v4057_v4 = vld [vmem:[#allocation37_spill] sm:$0xff] }
  0xf4   :  { %2264 = vmatprep.subr.mxu0 %v4038_v30  ;;  %2291 = vmatprep.subr.mxu1 %v3055_v21  ;;  %v4043_v21 = vand.u32 4294901760, %v3254_v7  ;;  %v4049_v7 = vand.u32 4294901760, %v3337_v54  ;;  %v4053_v54 = vand.u32 4294901760, %v3380_v45  ;;  %v4059_v45 = vand.u32 4294901760, %v4058_v13 }
  0xf5   :  { %2265 = vmatpush3.msra.mxu0 %v4039_v12  ;;  %2292 = vmatpush3.msra.mxu1 %v4004_v38 }
  0xf6   :  { %2266 = vmatprep.subr.mxu0 %v4040_v9  ;;  %2293 = vmatprep.subr.mxu1 %v4005_v63 }
  0xf7   :  { %2267 = vmatpush3.msra.mxu0 %v4041_v3  ;;  %2294 = vmatpush3.msra.mxu1 %v4007_v22 }
  0xf8   :  { %2268 = vmatprep.subr.mxu0 %v4042_v51  ;;  %2295 = vmatprep.subr.mxu1 %v4008_v35 }
  0xf9   :  { %2269 = vmatpush3.msra.mxu0 %v4043_v21  ;;  %2296 = vmatpush3.msra.mxu1 %v4009_v2 }
  0xfa   :  { %2270 = vmatprep.subr.mxu0 %v4044_v34  ;;  %2297 = vmatprep.subr.mxu1 %v4011_v46 }
  0xfb   :  { %2271 = vmatpush3.msra.mxu0 %v4045_v53  ;;  %2298 = vmatpush3.msra.mxu1 %v4013_v6 }
  0xfc   :  { %2272 = vmatprep.subr.mxu0 %v4046_v44  ;;  %2299 = vmatprep.subr.mxu1 %v4014_v57 }
  0xfd   :  { %2273 = vmatpush3.msra.mxu0 %v4047_v18  ;;  %2300 = vmatpush3.msra.mxu1 %v4015_v17 }
  0xfe   :  { %2274 = vmatprep.subr.mxu0 %v4048_v39  ;;  %2301 = vmatprep.subr.mxu1 %v4016_v41 }
  0xff   :  { %2275 = vmatpush3.msra.mxu0 %v4049_v7  ;;  %2302 = vmatpush3.msra.mxu1 %v4017_v49 }
 0x100   :  { %2276 = vmatprep.subr.mxu0 %v4050_v11  ;;  %2303 = vmatprep.subr.mxu1 %v4018_v52  ;;  %v1884_v11 = vld [vmem:[%s3703_s4] sm:$0x1] }
 0x101   :  { %2277 = vmatpush3.msra.mxu0 %v4051_v56  ;;  %2304 = vmatpush3.msra.mxu1 %v4019_v55 }
 0x102   :  { %2278 = vmatprep.subr.mxu0 %v4052_v28  ;;  %2305 = vmatprep.subr.mxu1 %v4020_v42 }
 0x103   :  { %2279 = vmatpush3.msra.mxu0 %v4053_v54  ;;  %2306 = vmatpush3.msra.mxu1 %v3207_v61  ;;  %v4061_v61 = vld [vmem:[#allocation43_spill] sm:$0xff] }
 0x104   :  { %2280 = vmatprep.subr.mxu0 %v4054_v0  ;;  %2307 = vmatprep.subr.mxu1 %v4021_v43  ;;  %v4062_v59 = vand.u32 4294901760, %v4061_v61  ;;  %v4063_v43 = vld [vmem:[#allocation44_spill] sm:$0xff] }
 0x105   :  { %2281 = vmatpush3.msra.mxu0 %v4055_v25  ;;  %2308 = vmatpush3.msra.mxu1 %v3266_v48  ;;  %v4064_v32 = vand.u32 4294901760, %v4063_v43  ;;  %v4066_v48 = vld [vmem:[#allocation36_spill] sm:$0xff] }
 0x106   :  { %2282 = vmatprep.subr.mxu0 %v4056_v8  ;;  %2309 = vmatprep.subr.mxu1 %v4057_v4 }
 0x107   :  { %2283 = vmatpush3.msra.mxu0 %v4059_v45  ;;  %2310 = vmatpush3.msra.mxu1 %v4060_v20 }
 0x108   :  { %2284 = vmatprep.subr.mxu0 %v4062_v59  ;;  %2311 = vmatprep.subr.mxu1 %v3313_v24 }
 0x109   :  { %2285 = vmatpush3.msra.mxu0 %v4064_v32  ;;  %1773 = vmatprep.mubr.f32.mxu0 %v4065_v36 }
 0x10a   :  { %2312 = vmatpush3.msra.mxu1 %v4066_v48  ;;  %1775 = vmatmul.mubr.f32.vlgmr.msra.gmra.mxu0 %v4067_v47 }
 0x10b   :  { %2313 = vmatprep.subr.mxu1 %v4023_v10  ;;  %1877 = vmatprep.mubr.f32.mxu1 %v4065_v36 }
 0x10c   :  { %2314 = vmatpush3.msra.mxu1 %v4025_v14 }
 0x10d   :  { %2315 = vmatprep.subr.mxu1 %v4027_v50 }
 0x10e   :  { %2316 = vmatpush3.msra.mxu1 %v3383_v15 }
 0x10f   :  { %2317 = vmatprep.subr.mxu1 %v3402_v40 }
 0x110   :  { %2318 = vmatpush3.msra.mxu1 %v3427_v19 }
 0x111   :  { %2319 = vmatprep.subr.mxu1 %v3434_v62 }
 0x112   :  { %2320 = vmatpush3.msra.mxu1 %v3441_v37 }
 0x113   :  { %1879 = vmatmul.mubr.f32.vlgmr.msra.gmra.mxu1 %v4067_v47 }
 0x122   :  { %v1936_v24 = vpop.f32.mrf.mxu0 }
 0x124   :  { %v1937_v10 = vpop.f32.mrf.mxu0 }
 0x125   :  { %v1938_v46 = vadd.f32 %v1937_v10, %v1936_v24 }
 0x127   :  { %v1971_v38 = vpop.f32.mrf.mxu1 }
 0x129   :  { %v1972_v63 = vpop.f32.mrf.mxu1 }
 0x12a   :  { %v1973_v33 = vadd.f32 %v1972_v63, %v1971_v38 }
 0x12c   :  { %v490_v6 = vadd.f32 %v1973_v33, %v1938_v46 }
 0x142   :  { %v2006_v14 = vpop.f32.mrf.mxu0 }
 0x144   :  { %v2007_v27 = vpop.f32.mrf.mxu0 }
 0x145   :  { %v2008_v62 = vadd.f32 %v2007_v27, %v2006_v14 }
 0x147   :  { %v628_v41 = vadd.f32 %v2008_v62, %v490_v6 }
 0x14a   :  { %v2041_v22 = vpop.f32.mrf.mxu1 }
 0x14c   :  { %v2042_v35 = vpop.f32.mrf.mxu1 }
 0x14d   :  { %v2043_v57 = vadd.f32 %v2042_v35, %v2041_v22 }
 0x14f   :  { %v736_v55 = vadd.f32 %v2043_v57, %v628_v41 }
 0x163   :  { %v2076_v50 = vpop.f32.mrf.mxu0 }
 0x165   :  { %v2077_v15 = vpop.f32.mrf.mxu0 }
 0x166   :  { %v2078_v49 = vadd.f32 %v2077_v15, %v2076_v50 }
 0x168   :  { %v904_v29 = vadd.f32 %v2078_v49, %v736_v55 }
 0x16c   :  { %v2111_v2 = vpop.f32.mrf.mxu1 }
 0x16e   :  { %v2112_v19 = vpop.f32.mrf.mxu1 }
 0x16f   :  { %v2113_v42 = vadd.f32 %v2112_v19, %v2111_v2 }
 0x171   :  { %v1008_v16 = vadd.f32 %v2113_v42, %v904_v29 }
 0x186   :  { %v2146_v40 = vpop.f32.mrf.mxu0 }
 0x188   :  { %v2147_v58 = vpop.f32.mrf.mxu0 }
 0x189   :  { %v2148_v1 = vadd.f32 %v2147_v58, %v2146_v40 }
 0x18b   :  { %v1131_v30 = vadd.f32 %v2148_v1, %v1008_v16 }
 0x191   :  { %v2181_v37 = vpop.f32.mrf.mxu1 }
 0x193   :  { %v2182_v52 = vpop.f32.mrf.mxu1 }
 0x194   :  { %v2183_v23 = vadd.f32 %v2182_v52, %v2181_v37 }
 0x196   :  { %v1363_v3 = vadd.f32 %v2183_v23, %v1131_v30 }
 0x1a8   :  { %v2216_v17 = vpop.f32.mrf.mxu0 }
 0x1aa   :  { %v2217_v60 = vpop.f32.mrf.mxu0 }
 0x1ab   :  { %v2218_v12 = vadd.f32 %v2217_v60, %v2216_v17 }
 0x1ad   :  { %v1501_v21 = vadd.f32 %v2218_v12, %v1363_v3 }
 0x1b1   :  { %v2251_v26 = vpop.f32.mrf.mxu1 }
 0x1b3   :  { %v2252_v5 = vpop.f32.mrf.mxu1 }
 0x1b4   :  { %v2253_v51 = vadd.f32 %v2252_v5, %v2251_v26 }
 0x1b6   :  { %v1609_v44 = vadd.f32 %v2253_v51, %v1501_v21 }
 0x1ca   :  { %v2286_v31 = vpop.f32.mrf.mxu0 }
 0x1cc   :  { %v2287_v9 = vpop.f32.mrf.mxu0 }
 0x1cd   :  { %v2288_v34 = vadd.f32 %v2287_v9, %v2286_v31 }
 0x1cf   :  { %v1777_v39 = vadd.f32 %v2288_v34, %v1609_v44 }
 0x1d3   :  { %v2321_v53 = vpop.f32.mrf.mxu1 }
 0x1d5   :  { %v2322_v18 = vpop.f32.mrf.mxu1 }
 0x1d6   :  { %v2323_v7 = vadd.f32 %v2322_v18, %v2321_v53 }
 0x1d8   :  { %v1881_v56 = vadd.f32 %v2323_v7, %v1777_v39 }
 0x1da   :  { %v1885_v28 = vadd.f32 %v1884_v11, %v1881_v56 }
 0x1dc   :  { %1886 = vst [vmem:[#allocation10] sm:$0x1] %v1885_v28 }
 0x1dd   :  { %2422 = shalt.err (!%p2419_p10)
}
 0x1de   :  { %1896 = dma.vmem_to_hbm [thread:$0]  %s1894_s14, 16, %s3704_s5, [#allocation4]  }
 0x1df   :  { %2437 = dma.done.wait [#allocation4], 16  }
 0x1e0   :  { %2438 = vsyncadd [#allocation4], 4294967280 }
 0x1e1   :  { %1900 = vsyncpa [#allocation3], 1 }
 0x1e2   :  { %1901 = vsyncpa [#allocation6], 1 }
 0x1e3   :  { %1902 = vsyncpa [#allocation9], 1 }
 0x1e4   :  { %1903 = vsyncpa [#allocation4], 1 }

</bundles_post_ra>
